<compile_context>
chip_gen: v7x
topology: tpu7x:2x2x1
jax: 0.10.0
libtpu: 0.0.40
codegen_flags: <defaults>
</compile_context>

<pallas_src>
import functools

import jax
import jax.numpy as jnp
from jax.experimental import pallas as pl
from jax.experimental.pallas import tpu as pltpu

EPS = 1e-5
_VMEM_LIMIT = 48 * 1024 * 1024   # > v5e 16 MiB default, < v7x 64 MiB physical


# ---------------------------------------------------------------------------
# Tiling helper
# ---------------------------------------------------------------------------
def _tile_rows(m, n):
    """Pick an M tile.

    Prefer an even tile count >= 4 so v7x's two TensorCores get equal work on
    the 'parallel' M axis; cap the tile at 256 rows when the output is wide
    (N >= 1024) so (tm, N) f32 output blocks stay small on v5e/v7x."""
    cands = (256, 128) if n >= 1024 else (512, 256, 128)
    for t in cands:
        if m % t == 0 and (m // t) % 2 == 0 and m // t >= 4:
            return t, m
    for t in cands:
        if m % t == 0:
            return t, m
    t = cands[-1]
    return t, ((m + t - 1) // t) * t          # pad rows; stats are masked


# ---------------------------------------------------------------------------
# Fused matmul kernel:  y = (x * scale + shift) @ w   (+ per-channel stats)
# Weight and scale/shift have constant block indices -> VMEM resident,
# fetched once for the whole grid.  No accumulator scratch (single K step).
# ---------------------------------------------------------------------------
def _fused_mm_kernel(x_ref, w_ref, ss_ref, y_ref, psum_ref, pssq_ref,
                     *, tm, m_valid, masked):
    # Input-side BN of the previous layer (scale/shift) in f32, bf16 MXU
    # operands, f32 accumulation (single-pass MXU).
    x = x_ref[...].astype(jnp.float32)
    x = x * ss_ref[0:1, :] + ss_ref[1:2, :]
    acc = jnp.dot(x.astype(jnp.bfloat16), w_ref[...],
                  preferred_element_type=jnp.float32)
    y_ref[...] = acc.astype(y_ref.dtype)
    if masked:  # padded rows must not bias the batch statistics
        rows = (jax.lax.broadcasted_iota(jnp.int32, acc.shape, 0)
                + pl.program_id(0) * tm)
        acc = jnp.where(rows < m_valid, acc, 0.0)
    psum_ref[...] = jnp.sum(acc, axis=0, keepdims=True)[None]
    pssq_ref[...] = jnp.sum(acc * acc, axis=0, keepdims=True)[None]


def fused_matmul_bn_stats(x, w_bf16, scale_shift, *, out_dtype=jnp.float32):
    """(M,K)@(K,N) with fused input scale/shift and fused per-column
    sum / sum-of-squares.  Returns (y, mean, var), mean/var of shape (1, N)."""
    m, k = x.shape
    kw, n = w_bf16.shape
    assert kw == k and scale_shift.shape == (2, k)
    tm, m_pad = _tile_rows(m, n)
    if m_pad != m:
        x = jnp.pad(x, ((0, m_pad - m), (0, 0)))
    n_m = m_pad // tm

    kern = functools.partial(_fused_mm_kernel, tm=tm, m_valid=m,
                             masked=(m_pad != m))
    y, psum, pssq = pl.pallas_call(
        kern,
        out_shape=(jax.ShapeDtypeStruct((m_pad, n), out_dtype),
                   jax.ShapeDtypeStruct((n_m, 1, n), jnp.float32),
                   jax.ShapeDtypeStruct((n_m, 1, n), jnp.float32)),
        grid_spec=pltpu.PrefetchScalarGridSpec(
            num_scalar_prefetch=0,
            grid=(n_m,),
            in_specs=[pl.BlockSpec((tm, k), lambda i: (i, 0)),
                      pl.BlockSpec((k, n), lambda i: (0, 0)),    # resident
                      pl.BlockSpec((2, k), lambda i: (0, 0))],   # resident
            out_specs=(pl.BlockSpec((tm, n), lambda i: (i, 0)),
                       pl.BlockSpec((1, 1, n), lambda i: (i, 0, 0)),
                       pl.BlockSpec((1, 1, n), lambda i: (i, 0, 0)))),
        compiler_params=pltpu.CompilerParams(
            dimension_semantics=("parallel",),
            vmem_limit_bytes=_VMEM_LIMIT),
    )(x, w_bf16, scale_shift)

    if m_pad != m:
        y = y[:m]
    s = jnp.sum(psum, axis=(0, 1)).reshape(1, n)
    ss = jnp.sum(pssq, axis=(0, 1)).reshape(1, n)
    mean = s / m
    # E[x^2]-E[x]^2 in f32 is adequate for O(1)-scaled post-BN activations.
    # TODO(synk): shifted / Welford-style combine for extreme |mean|/std.
    var = jnp.maximum(ss / m - mean * mean, 0.0)
    return y, mean, var


# ---------------------------------------------------------------------------
# Fused epilogue:  out = relu(y*s3 + b3) + (res*sd + bd)
# Output aliased onto y (the epilogue is purely HBM-bound).
# ---------------------------------------------------------------------------
def _bn_relu_add_kernel(y_ref, pm_ref, r_ref, pr_ref, o_ref):
    y = y_ref[...].astype(jnp.float32)
    z = jnp.maximum(y * pm_ref[0:1, :] + pm_ref[1:2, :], 0.0)
    r = r_ref[...].astype(jnp.float32)
    o_ref[...] = z + r * pr_ref[0:1, :] + pr_ref[1:2, :]


def bn_relu_add(y, pack_main, res, pack_res):
    m, c = y.shape
    tm, m_pad = _tile_rows(m, c)
    if m_pad != m:
        y = jnp.pad(y, ((0, m_pad - m), (0, 0)))
        res = jnp.pad(res, ((0, m_pad - m), (0, 0)))
    out = pl.pallas_call(
        _bn_relu_add_kernel,
        out_shape=jax.ShapeDtypeStruct((m_pad, c), jnp.float32),
        grid_spec=pltpu.PrefetchScalarGridSpec(
            num_scalar_prefetch=0,
            grid=(m_pad // tm,),
            in_specs=[pl.BlockSpec((tm, c), lambda i: (i, 0)),
                      pl.BlockSpec((2, c), lambda i: (0, 0)),
                      pl.BlockSpec((tm, c), lambda i: (i, 0)),
                      pl.BlockSpec((2, c), lambda i: (0, 0))],
            out_specs=pl.BlockSpec((tm, c), lambda i: (i, 0))),
        input_output_aliases={0: 0},          # write result in-place over y
        compiler_params=pltpu.CompilerParams(
            dimension_semantics=("parallel",),
            vmem_limit_bytes=_VMEM_LIMIT),
    )(y, pack_main, res, pack_res)
    return out[:m] if m_pad != m else out


# ---------------------------------------------------------------------------
# BatchNorm folding helpers (tiny (C,)-sized XLA ops between kernels)
# ---------------------------------------------------------------------------
def _scale_shift(mean, var, gamma, beta):
    s = gamma.reshape(1, -1) * jax.lax.rsqrt(var + EPS)
    b = beta.reshape(1, -1) - mean * s
    return s, b


def _pack_scale_shift(mean, var, gamma, beta):
    s, b = _scale_shift(mean, var, gamma, beta)
    return jnp.concatenate([s, b], axis=0)        # (2, C)


def _identity_scale_shift(c):
    return jnp.concatenate([jnp.ones((1, c), jnp.float32),
                            jnp.zeros((1, c), jnp.float32)], axis=0)


# ---------------------------------------------------------------------------
# Parameter packing: transpose + bf16-cast weights ONCE (not per forward)
# ---------------------------------------------------------------------------
def pack_params(params, is_first):
    c_mid = params["w2"].shape[0]
    packed = {
        "w1": jnp.transpose(params["w1"][:, :, 0, 0]).astype(jnp.bfloat16),
        "w2": jnp.transpose(params["w2"], (2, 3, 1, 0))
                 .reshape(9 * c_mid, c_mid).astype(jnp.bfloat16),
        "w3": jnp.transpose(params["w3"][:, :, 0, 0]).astype(jnp.bfloat16),
        "g1": params["g1"], "b1": params["b1"],
        "g2": params["g2"], "b2": params["b2"],
        "g3": params["g3"], "b3": params["b3"],
    }
    if is_first:
        packed["wd"] = jnp.transpose(params["wd"][:, :, 0, 0]).astype(jnp.bfloat16)
        packed["gd"] = params["gd"]
        packed["bd"] = params["bd"]
    return packed


# ---------------------------------------------------------------------------
# Bottleneck forward (Pallas path, NHWC / channels-on-lanes)
# ---------------------------------------------------------------------------
def bottleneck_forward_nhwc(packed, x_nhwc, stride=2, is_first=False):
    n, h, w, cin = x_nhwc.shape
    c_mid = packed["w1"].shape[1]
    c_out = packed["w3"].shape[1]
    x2d = x_nhwc.reshape(-1, cin)

    # conv1: 1x1 stride 1 (per-channel stats fused in the matmul epilogue)
    y1, m1, v1 = fused_matmul_bn_stats(x2d, packed["w1"],
                                       _identity_scale_shift(cin))
    s1, b1 = _scale_shift(m1, v1, packed["g1"], packed["b1"])

    # BN1 is applied BEFORE zero-padding (padding must be zero in the
    # normalized domain), in bf16 so the 9x im2col moves at half width.
    z1 = (y1 * s1 + b1).astype(jnp.bfloat16).reshape(n, h, w, c_mid)

    # conv2: 3x3, stride = `stride` iff is_first else 1, padding 1
    s = stride if is_first else 1
    ho = (h + 2 - 3) // s + 1
    wo = (w + 2 - 3) // s + 1
    zp = jnp.pad(z1, ((0, 0), (1, 1), (1, 1), (0, 0)))
    # TODO(synk): replace the JAX-level im2col with an in-kernel 9-tap K
    # reduction over HBM-resident z1 (memory_space=pl.ANY + manual DMA) to
    # remove this HBM round trip entirely.
    cols = jnp.concatenate(
        [zp[:, dy:dy + s * (ho - 1) + 1:s, dx:dx + s * (wo - 1) + 1:s, :]
         for dy in range(3) for dx in range(3)], axis=-1)   # (n, ho, wo, 9*c_mid)
    y2, m2, v2 = fused_matmul_bn_stats(cols.reshape(-1, 9 * c_mid),
                                       packed["w2"],
                                       _identity_scale_shift(9 * c_mid))
    ss2 = _pack_scale_shift(m2, v2, packed["g2"], packed["b2"])

    # conv3: 1x1 (BN2 folded into the prologue; BN3+ReLU+residual fused below)
    y3, m3, v3 = fused_matmul_bn_stats(y2, packed["w3"], ss2)
    ss3 = _pack_scale_shift(m3, v3, packed["g3"], packed["b3"])

    # residual path
    if is_first:
        xd = x_nhwc[:, ::stride, ::stride, :].reshape(-1, cin)
        yd, md, vd = fused_matmul_bn_stats(xd, packed["wd"],
                                           _identity_scale_shift(cin))
        res = yd
        ssd = _pack_scale_shift(md, vd, packed["gd"], packed["bd"])
    else:
        res = x2d                                  # cin == c_out here
        ssd = _identity_scale_shift(c_out)

    out = bn_relu_add(y3, ss3, res, ssd)           # relu(bn3) + bn_d(res)
    return out.reshape(n, ho, wo, c_out)


@functools.partial(jax.jit, static_argnames=("stride", "is_first"))
def bottleneck_forward(packed, x_nchw, stride=2, is_first=False):
    # NCHW wrapper for the PyTorch layout; a multi-block network should stay
    # in NHWC and only transpose at network entry/exit.
    x = jnp.transpose(x_nchw.astype(jnp.float32), (0, 2, 3, 1))
    out = bottleneck_forward_nhwc(packed, x, stride=stride, is_first=is_first)
    return jnp.transpose(out, (0, 3, 1, 2))


# ---------------------------------------------------------------------------
# Pure-JAX reference (lax.conv, f32 HIGHEST) for correctness check
# ---------------------------------------------------------------------------
def ref_bottleneck(params, x, stride=2, is_first=False):
    def conv(a, wgt, s, pad):
        return jax.lax.conv_general_dilated(
            a, wgt, window_strides=(s, s), padding=pad,
            dimension_numbers=("NCHW", "OIHW", "NCHW"),
            precision=jax.lax.Precision.HIGHEST)

    def bn(a, g, b):
        mean = jnp.mean(a, axis=(0, 2, 3), keepdims=True)
        var = jnp.mean((a - mean) ** 2, axis=(0, 2, 3), keepdims=True)
        return ((a - mean) * jax.lax.rsqrt(var + EPS)
                * g.reshape(1, -1, 1, 1) + b.reshape(1, -1, 1, 1))

    s3 = stride if is_first else 1
    hdn = conv(x, params["w1"], 1, "VALID")
    hdn = bn(hdn, params["g1"], params["b1"])
    hdn = conv(hdn, params["w2"], s3, [(1, 1), (1, 1)])
    hdn = bn(hdn, params["g2"], params["b2"])
    hdn = conv(hdn, params["w3"], 1, "VALID")
    hdn = jnp.maximum(bn(hdn, params["g3"], params["b3"]), 0.0)
    if is_first:
        d = conv(x, params["wd"], stride, "VALID")
        d = bn(d, params["gd"], params["bd"])
        return hdn + d
    return hdn + x


# ---------------------------------------------------------------------------
# Deterministic parameter init (shapes from the PyTorch __init__)
# ---------------------------------------------------------------------------
def init_params(key, c_in, c_out, last_out, is_first):
    ks = jax.random.split(key, 12)

    def winit(k, shape):
        fan_in = shape[1] * shape[2] * shape[3]
        return jax.random.normal(k, shape, jnp.float32) * (2.0 / fan_in) ** 0.5

    in1 = last_out if is_first else c_out
    p = {
        "w1": winit(ks[0], (c_in, in1, 1, 1)),
        "g1": 1.0 + 0.1 * jax.random.normal(ks[1], (c_in,), jnp.float32),
        "b1": 0.1 * jax.random.normal(ks[2], (c_in,), jnp.float32),
        "w2": winit(ks[3], (c_in, c_in, 3, 3)),
        "g2": 1.0 + 0.1 * jax.random.normal(ks[4], (c_in,), jnp.float32),
        "b2": 0.1 * jax.random.normal(ks[5], (c_in,), jnp.float32),
        "w3": winit(ks[6], (c_out, c_in, 1, 1)),
        "g3": 1.0 + 0.1 * jax.random.normal(ks[7], (c_out,), jnp.float32),
        "b3": 0.1 * jax.random.normal(ks[8], (c_out,), jnp.float32),
    }
    if is_first:
        p["wd"] = winit(ks[9], (c_out, last_out, 1, 1))
        p["gd"] = 1.0 + 0.1 * jax.random.normal(ks[10], (c_out,), jnp.float32)
        p["bd"] = 0.1 * jax.random.normal(ks[11], (c_out,), jnp.float32)
    return p


# TODO(synk): nn.BatchNorm2d running-stat updates are a training side effect
# with no forward-output impact; not reproduced here.
# TODO(synk): pad sub-128 output channel counts (e.g. stage-1 c_mid=64) to a
# lane-dense 128 multiple to avoid masked partial stores in the epilogue.

if __name__ == "__main__":
    key = jax.random.PRNGKey(0)
    kx1, kp1, kx2, kp2 = jax.random.split(key, 4)

    # is_first=True block (with downsample), stride 2: x (2, 4, 16, 16)
    x1 = jax.random.normal(kx1, (2, 4, 16, 16), jnp.float32)
    p1 = init_params(kp1, c_in=4, c_out=16, last_out=4, is_first=True)
    pk1 = pack_params(p1, is_first=True)
    out1 = jax.block_until_ready(
        bottleneck_forward(pk1, x1, stride=2, is_first=True))
    ref1 = ref_bottleneck(p1, x1, stride=2, is_first=True)
    assert out1.shape == (2, 16, 8, 8)
    assert jnp.allclose(out1, ref1, atol=5e-2, rtol=5e-2), \
        float(jnp.max(jnp.abs(out1 - ref1)))

    # is_first=False block (identity residual): x (2, 16, 8, 8)
    x2 = jax.random.normal(kx2, (2, 16, 8, 8), jnp.float32)
    p2 = init_params(kp2, c_in=4, c_out=16, last_out=4, is_first=False)
    pk2 = pack_params(p2, is_first=False)
    out2 = jax.block_until_ready(
        bottleneck_forward(pk2, x2, stride=2, is_first=False))
    ref2 = ref_bottleneck(p2, x2, stride=2, is_first=False)
    assert out2.shape == (2, 16, 8, 8)
    assert jnp.allclose(out2, ref2, atol=5e-2, rtol=5e-2), \
        float(jnp.max(jnp.abs(out2 - ref2)))

    print("KERNEL_OK")
</pallas_src>

<mosaic_0001>
module attributes {stable_mosaic.version = 11 : i64} {
  func.func @_fused_mm_kernel(%arg0: i32, %arg1: memref<128x4xf32, #tpu.memory_space<vmem>>, %arg2: memref<4x4xbf16, #tpu.memory_space<vmem>>, %arg3: memref<2x4xf32, #tpu.memory_space<vmem>>, %arg4: memref<128x4xf32, #tpu.memory_space<vmem>>, %arg5: memref<1x1x4xf32, #tpu.memory_space<vmem>>, %arg6: memref<1x1x4xf32, #tpu.memory_space<vmem>>) attributes {dimension_semantics = [#tpu.dimension_semantics<parallel>], iteration_bounds = array<i64: 4>, scalar_prefetch = 0 : i64, scratch_operands = 0 : i64, tpu.core_type = #tpu.core_type<tc>, window_params = [{transform_indices = @transform_0, window_bounds = array<i64: 128, 4>}, {pipeline_mode = #tpu.pipeline_mode<synchronous>, transform_indices = @transform_1, window_bounds = array<i64: 4, 4>}, {pipeline_mode = #tpu.pipeline_mode<synchronous>, transform_indices = @transform_2, window_bounds = array<i64: 2, 4>}, {transform_indices = @transform_3, window_bounds = array<i64: 128, 4>}, {transform_indices = @transform_4, window_bounds = array<i64: 1, 1, 4>}, {transform_indices = @transform_5, window_bounds = array<i64: 1, 1, 4>}]} {
    %c0 = arith.constant 0 : index
    %c0_0 = arith.constant 0 : index
    %0 = vector.load %arg1[%c0, %c0_0] : memref<128x4xf32, #tpu.memory_space<vmem>>, vector<128x4xf32>
    %c0_1 = arith.constant 0 : index
    %c0_2 = arith.constant 0 : index
    %1 = vector.load %arg3[%c0_1, %c0_2] : memref<2x4xf32, #tpu.memory_space<vmem>>, vector<1x4xf32>
    %2 = vector.broadcast %1 : vector<1x4xf32> to vector<128x4xf32>
    %3 = arith.mulf %0, %2 : vector<128x4xf32>
    %c1 = arith.constant 1 : index
    %c0_3 = arith.constant 0 : index
    %4 = vector.load %arg3[%c1, %c0_3] : memref<2x4xf32, #tpu.memory_space<vmem>>, vector<1x4xf32>
    %5 = vector.broadcast %4 : vector<1x4xf32> to vector<128x4xf32>
    %6 = arith.addf %3, %5 : vector<128x4xf32>
    %7 = arith.truncf %6 : vector<128x4xf32> to vector<128x4xbf16>
    %c0_4 = arith.constant 0 : index
    %c0_5 = arith.constant 0 : index
    %8 = vector.load %arg2[%c0_4, %c0_5] : memref<4x4xbf16, #tpu.memory_space<vmem>>, vector<4x4xbf16>
    %cst = arith.constant dense<0.000000e+00> : vector<128x4xf32>
    %9 = tpu.matmul %7, %8, %cst {dimension_numbers = #tpu.dot_dimension_numbers<[1], [0], [0], [1], [0, 0, 1, 1], [], []>} : vector<128x4xbf16>, vector<4x4xbf16>, vector<128x4xf32> -> vector<128x4xf32>
    %c0_6 = arith.constant 0 : index
    %c0_7 = arith.constant 0 : index
    %10 = vector.load %arg4[%c0_6, %c0_7] : memref<128x4xf32, #tpu.memory_space<vmem>>, vector<128x4xf32>
    tpu.vector_store %arg4[%c0_6, %c0_7], %9 {strides = array<i32>} : memref<128x4xf32, #tpu.memory_space<vmem>>, vector<128x4xf32>,
    %cst_8 = arith.constant dense<0.000000e+00> : vector<4xf32>
    %11 = vector.multi_reduction <add>, %9, %cst_8 [0] : vector<128x4xf32> to vector<4xf32>
    %12 = vector.shape_cast %11 : vector<4xf32> to vector<1x4xf32>
    %13 = vector.shape_cast %12 : vector<1x4xf32> to vector<1x1x4xf32>
    %c0_9 = arith.constant 0 : index
    %c0_10 = arith.constant 0 : index
    %c0_11 = arith.constant 0 : index
    %14 = vector.load %arg5[%c0_9, %c0_10, %c0_11] : memref<1x1x4xf32, #tpu.memory_space<vmem>>, vector<1x1x4xf32>
    tpu.vector_store %arg5[%c0_9, %c0_10, %c0_11], %13 {strides = array<i32>} : memref<1x1x4xf32, #tpu.memory_space<vmem>>, vector<1x1x4xf32>,
    %15 = arith.mulf %9, %9 : vector<128x4xf32>
    %cst_12 = arith.constant dense<0.000000e+00> : vector<4xf32>
    %16 = vector.multi_reduction <add>, %15, %cst_12 [0] : vector<128x4xf32> to vector<4xf32>
    %17 = vector.shape_cast %16 : vector<4xf32> to vector<1x4xf32>
    %18 = vector.shape_cast %17 : vector<1x4xf32> to vector<1x1x4xf32>
    %c0_13 = arith.constant 0 : index
    %c0_14 = arith.constant 0 : index
    %c0_15 = arith.constant 0 : index
    %19 = vector.load %arg6[%c0_13, %c0_14, %c0_15] : memref<1x1x4xf32, #tpu.memory_space<vmem>>, vector<1x1x4xf32>
    tpu.vector_store %arg6[%c0_13, %c0_14, %c0_15], %18 {strides = array<i32>} : memref<1x1x4xf32, #tpu.memory_space<vmem>>, vector<1x1x4xf32>,
    return
  }
  func.func @transform_0(%arg0: i32) -> (i32, i32) {
    %c0_i32 = arith.constant 0 : i32
    %c0_i32_0 = arith.constant 0 : i32
    return %arg0, %c0_i32 : i32, i32
  }
  func.func @transform_1(%arg0: i32) -> (i32, i32) {
    %c0_i32 = arith.constant 0 : i32
    %c0_i32_0 = arith.constant 0 : i32
    %c0_i32_1 = arith.constant 0 : i32
    return %c0_i32, %c0_i32_0 : i32, i32
  }
  func.func @transform_2(%arg0: i32) -> (i32, i32) {
    %c0_i32 = arith.constant 0 : i32
    %c0_i32_0 = arith.constant 0 : i32
    %c0_i32_1 = arith.constant 0 : i32
    return %c0_i32, %c0_i32_0 : i32, i32
  }
  func.func @transform_3(%arg0: i32) -> (i32, i32) {
    %c0_i32 = arith.constant 0 : i32
    %c0_i32_0 = arith.constant 0 : i32
    return %arg0, %c0_i32 : i32, i32
  }
  func.func @transform_4(%arg0: i32) -> (i32, i32, i32) {
    %c0_i32 = arith.constant 0 : i32
    %c0_i32_0 = arith.constant 0 : i32
    %c0_i32_1 = arith.constant 0 : i32
    return %arg0, %c0_i32, %c0_i32_0 : i32, i32, i32
  }
  func.func @transform_5(%arg0: i32) -> (i32, i32, i32) {
    %c0_i32 = arith.constant 0 : i32
    %c0_i32_0 = arith.constant 0 : i32
    %c0_i32_1 = arith.constant 0 : i32
    return %arg0, %c0_i32, %c0_i32_0 : i32, i32, i32
  }
}

module attributes {stable_mosaic.version = 11 : i64} {
  func.func @_fused_mm_kernel(%arg0: i32, %arg1: memref<128x36xbf16, #tpu.memory_space<vmem>>, %arg2: memref<36x4xbf16, #tpu.memory_space<vmem>>, %arg3: memref<2x36xf32, #tpu.memory_space<vmem>>, %arg4: memref<128x4xf32, #tpu.memory_space<vmem>>, %arg5: memref<1x1x4xf32, #tpu.memory_space<vmem>>, %arg6: memref<1x1x4xf32, #tpu.memory_space<vmem>>) attributes {dimension_semantics = [#tpu.dimension_semantics<parallel>], iteration_bounds = array<i64: 1>, scalar_prefetch = 0 : i64, scratch_operands = 0 : i64, tpu.core_type = #tpu.core_type<tc>, window_params = [{transform_indices = @transform_0, window_bounds = array<i64: 128, 36>}, {pipeline_mode = #tpu.pipeline_mode<synchronous>, transform_indices = @transform_1, window_bounds = array<i64: 36, 4>}, {pipeline_mode = #tpu.pipeline_mode<synchronous>, transform_indices = @transform_2, window_bounds = array<i64: 2, 36>}, {transform_indices = @transform_3, window_bounds = array<i64: 128, 4>}, {transform_indices = @transform_4, window_bounds = array<i64: 1, 1, 4>}, {transform_indices = @transform_5, window_bounds = array<i64: 1, 1, 4>}]} {
    %c0 = arith.constant 0 : index
    %c0_0 = arith.constant 0 : index
    %0 = vector.load %arg1[%c0, %c0_0] : memref<128x36xbf16, #tpu.memory_space<vmem>>, vector<128x36xbf16>
    %1 = arith.extf %0 : vector<128x36xbf16> to vector<128x36xf32>
    %c0_1 = arith.constant 0 : index
    %c0_2 = arith.constant 0 : index
    %2 = vector.load %arg3[%c0_1, %c0_2] : memref<2x36xf32, #tpu.memory_space<vmem>>, vector<1x36xf32>
    %3 = vector.broadcast %2 : vector<1x36xf32> to vector<128x36xf32>
    %4 = arith.mulf %1, %3 : vector<128x36xf32>
    %c1 = arith.constant 1 : index
    %c0_3 = arith.constant 0 : index
    %5 = vector.load %arg3[%c1, %c0_3] : memref<2x36xf32, #tpu.memory_space<vmem>>, vector<1x36xf32>
    %6 = vector.broadcast %5 : vector<1x36xf32> to vector<128x36xf32>
    %7 = arith.addf %4, %6 : vector<128x36xf32>
    %8 = arith.truncf %7 : vector<128x36xf32> to vector<128x36xbf16>
    %c0_4 = arith.constant 0 : index
    %c0_5 = arith.constant 0 : index
    %9 = vector.load %arg2[%c0_4, %c0_5] : memref<36x4xbf16, #tpu.memory_space<vmem>>, vector<36x4xbf16>
    %cst = arith.constant dense<0.000000e+00> : vector<128x4xf32>
    %10 = tpu.matmul %8, %9, %cst {dimension_numbers = #tpu.dot_dimension_numbers<[1], [0], [0], [1], [0, 0, 1, 1], [], []>} : vector<128x36xbf16>, vector<36x4xbf16>, vector<128x4xf32> -> vector<128x4xf32>
    %c0_6 = arith.constant 0 : index
    %c0_7 = arith.constant 0 : index
    %11 = vector.load %arg4[%c0_6, %c0_7] : memref<128x4xf32, #tpu.memory_space<vmem>>, vector<128x4xf32>
    tpu.vector_store %arg4[%c0_6, %c0_7], %10 {strides = array<i32>} : memref<128x4xf32, #tpu.memory_space<vmem>>, vector<128x4xf32>,
    %cst_8 = arith.constant dense<0.000000e+00> : vector<4xf32>
    %12 = vector.multi_reduction <add>, %10, %cst_8 [0] : vector<128x4xf32> to vector<4xf32>
    %13 = vector.shape_cast %12 : vector<4xf32> to vector<1x4xf32>
    %14 = vector.shape_cast %13 : vector<1x4xf32> to vector<1x1x4xf32>
    %c0_9 = arith.constant 0 : index
    %c0_10 = arith.constant 0 : index
    %c0_11 = arith.constant 0 : index
    %15 = vector.load %arg5[%c0_9, %c0_10, %c0_11] : memref<1x1x4xf32, #tpu.memory_space<vmem>>, vector<1x1x4xf32>
    tpu.vector_store %arg5[%c0_9, %c0_10, %c0_11], %14 {strides = array<i32>} : memref<1x1x4xf32, #tpu.memory_space<vmem>>, vector<1x1x4xf32>,
    %16 = arith.mulf %10, %10 : vector<128x4xf32>
    %cst_12 = arith.constant dense<0.000000e+00> : vector<4xf32>
    %17 = vector.multi_reduction <add>, %16, %cst_12 [0] : vector<128x4xf32> to vector<4xf32>
    %18 = vector.shape_cast %17 : vector<4xf32> to vector<1x4xf32>
    %19 = vector.shape_cast %18 : vector<1x4xf32> to vector<1x1x4xf32>
    %c0_13 = arith.constant 0 : index
    %c0_14 = arith.constant 0 : index
    %c0_15 = arith.constant 0 : index
    %20 = vector.load %arg6[%c0_13, %c0_14, %c0_15] : memref<1x1x4xf32, #tpu.memory_space<vmem>>, vector<1x1x4xf32>
    tpu.vector_store %arg6[%c0_13, %c0_14, %c0_15], %19 {strides = array<i32>} : memref<1x1x4xf32, #tpu.memory_space<vmem>>, vector<1x1x4xf32>,
    return
  }
  func.func @transform_0(%arg0: i32) -> (i32, i32) {
    %c0_i32 = arith.constant 0 : i32
    %c0_i32_0 = arith.constant 0 : i32
    return %arg0, %c0_i32 : i32, i32
  }
  func.func @transform_1(%arg0: i32) -> (i32, i32) {
    %c0_i32 = arith.constant 0 : i32
    %c0_i32_0 = arith.constant 0 : i32
    %c0_i32_1 = arith.constant 0 : i32
    return %c0_i32, %c0_i32_0 : i32, i32
  }
  func.func @transform_2(%arg0: i32) -> (i32, i32) {
    %c0_i32 = arith.constant 0 : i32
    %c0_i32_0 = arith.constant 0 : i32
    %c0_i32_1 = arith.constant 0 : i32
    return %c0_i32, %c0_i32_0 : i32, i32
  }
  func.func @transform_3(%arg0: i32) -> (i32, i32) {
    %c0_i32 = arith.constant 0 : i32
    %c0_i32_0 = arith.constant 0 : i32
    return %arg0, %c0_i32 : i32, i32
  }
  func.func @transform_4(%arg0: i32) -> (i32, i32, i32) {
    %c0_i32 = arith.constant 0 : i32
    %c0_i32_0 = arith.constant 0 : i32
    %c0_i32_1 = arith.constant 0 : i32
    return %arg0, %c0_i32, %c0_i32_0 : i32, i32, i32
  }
  func.func @transform_5(%arg0: i32) -> (i32, i32, i32) {
    %c0_i32 = arith.constant 0 : i32
    %c0_i32_0 = arith.constant 0 : i32
    %c0_i32_1 = arith.constant 0 : i32
    return %arg0, %c0_i32, %c0_i32_0 : i32, i32, i32
  }
}

module attributes {stable_mosaic.version = 11 : i64} {
  func.func @_fused_mm_kernel(%arg0: i32, %arg1: memref<128x4xf32, #tpu.memory_space<vmem>>, %arg2: memref<4x16xbf16, #tpu.memory_space<vmem>>, %arg3: memref<2x4xf32, #tpu.memory_space<vmem>>, %arg4: memref<128x16xf32, #tpu.memory_space<vmem>>, %arg5: memref<1x1x16xf32, #tpu.memory_space<vmem>>, %arg6: memref<1x1x16xf32, #tpu.memory_space<vmem>>) attributes {dimension_semantics = [#tpu.dimension_semantics<parallel>], iteration_bounds = array<i64: 1>, scalar_prefetch = 0 : i64, scratch_operands = 0 : i64, tpu.core_type = #tpu.core_type<tc>, window_params = [{transform_indices = @transform_0, window_bounds = array<i64: 128, 4>}, {pipeline_mode = #tpu.pipeline_mode<synchronous>, transform_indices = @transform_1, window_bounds = array<i64: 4, 16>}, {pipeline_mode = #tpu.pipeline_mode<synchronous>, transform_indices = @transform_2, window_bounds = array<i64: 2, 4>}, {transform_indices = @transform_3, window_bounds = array<i64: 128, 16>}, {transform_indices = @transform_4, window_bounds = array<i64: 1, 1, 16>}, {transform_indices = @transform_5, window_bounds = array<i64: 1, 1, 16>}]} {
    %c0 = arith.constant 0 : index
    %c0_0 = arith.constant 0 : index
    %0 = vector.load %arg1[%c0, %c0_0] : memref<128x4xf32, #tpu.memory_space<vmem>>, vector<128x4xf32>
    %c0_1 = arith.constant 0 : index
    %c0_2 = arith.constant 0 : index
    %1 = vector.load %arg3[%c0_1, %c0_2] : memref<2x4xf32, #tpu.memory_space<vmem>>, vector<1x4xf32>
    %2 = vector.broadcast %1 : vector<1x4xf32> to vector<128x4xf32>
    %3 = arith.mulf %0, %2 : vector<128x4xf32>
    %c1 = arith.constant 1 : index
    %c0_3 = arith.constant 0 : index
    %4 = vector.load %arg3[%c1, %c0_3] : memref<2x4xf32, #tpu.memory_space<vmem>>, vector<1x4xf32>
    %5 = vector.broadcast %4 : vector<1x4xf32> to vector<128x4xf32>
    %6 = arith.addf %3, %5 : vector<128x4xf32>
    %7 = arith.truncf %6 : vector<128x4xf32> to vector<128x4xbf16>
    %c0_4 = arith.constant 0 : index
    %c0_5 = arith.constant 0 : index
    %8 = vector.load %arg2[%c0_4, %c0_5] : memref<4x16xbf16, #tpu.memory_space<vmem>>, vector<4x16xbf16>
    %cst = arith.constant dense<0.000000e+00> : vector<128x16xf32>
    %9 = tpu.matmul %7, %8, %cst {dimension_numbers = #tpu.dot_dimension_numbers<[1], [0], [0], [1], [0, 0, 1, 1], [], []>} : vector<128x4xbf16>, vector<4x16xbf16>, vector<128x16xf32> -> vector<128x16xf32>
    %c0_6 = arith.constant 0 : index
    %c0_7 = arith.constant 0 : index
    %10 = vector.load %arg4[%c0_6, %c0_7] : memref<128x16xf32, #tpu.memory_space<vmem>>, vector<128x16xf32>
    tpu.vector_store %arg4[%c0_6, %c0_7], %9 {strides = array<i32>} : memref<128x16xf32, #tpu.memory_space<vmem>>, vector<128x16xf32>,
    %cst_8 = arith.constant dense<0.000000e+00> : vector<16xf32>
    %11 = vector.multi_reduction <add>, %9, %cst_8 [0] : vector<128x16xf32> to vector<16xf32>
    %12 = vector.shape_cast %11 : vector<16xf32> to vector<1x16xf32>
    %13 = vector.shape_cast %12 : vector<1x16xf32> to vector<1x1x16xf32>
    %c0_9 = arith.constant 0 : index
    %c0_10 = arith.constant 0 : index
    %c0_11 = arith.constant 0 : index
    %14 = vector.load %arg5[%c0_9, %c0_10, %c0_11] : memref<1x1x16xf32, #tpu.memory_space<vmem>>, vector<1x1x16xf32>
    tpu.vector_store %arg5[%c0_9, %c0_10, %c0_11], %13 {strides = array<i32>} : memref<1x1x16xf32, #tpu.memory_space<vmem>>, vector<1x1x16xf32>,
    %15 = arith.mulf %9, %9 : vector<128x16xf32>
    %cst_12 = arith.constant dense<0.000000e+00> : vector<16xf32>
    %16 = vector.multi_reduction <add>, %15, %cst_12 [0] : vector<128x16xf32> to vector<16xf32>
    %17 = vector.shape_cast %16 : vector<16xf32> to vector<1x16xf32>
    %18 = vector.shape_cast %17 : vector<1x16xf32> to vector<1x1x16xf32>
    %c0_13 = arith.constant 0 : index
    %c0_14 = arith.constant 0 : index
    %c0_15 = arith.constant 0 : index
    %19 = vector.load %arg6[%c0_13, %c0_14, %c0_15] : memref<1x1x16xf32, #tpu.memory_space<vmem>>, vector<1x1x16xf32>
    tpu.vector_store %arg6[%c0_13, %c0_14, %c0_15], %18 {strides = array<i32>} : memref<1x1x16xf32, #tpu.memory_space<vmem>>, vector<1x1x16xf32>,
    return
  }
  func.func @transform_0(%arg0: i32) -> (i32, i32) {
    %c0_i32 = arith.constant 0 : i32
    %c0_i32_0 = arith.constant 0 : i32
    return %arg0, %c0_i32 : i32, i32
  }
  func.func @transform_1(%arg0: i32) -> (i32, i32) {
    %c0_i32 = arith.constant 0 : i32
    %c0_i32_0 = arith.constant 0 : i32
    %c0_i32_1 = arith.constant 0 : i32
    return %c0_i32, %c0_i32_0 : i32, i32
  }
  func.func @transform_2(%arg0: i32) -> (i32, i32) {
    %c0_i32 = arith.constant 0 : i32
    %c0_i32_0 = arith.constant 0 : i32
    %c0_i32_1 = arith.constant 0 : i32
    return %c0_i32, %c0_i32_0 : i32, i32
  }
  func.func @transform_3(%arg0: i32) -> (i32, i32) {
    %c0_i32 = arith.constant 0 : i32
    %c0_i32_0 = arith.constant 0 : i32
    return %arg0, %c0_i32 : i32, i32
  }
  func.func @transform_4(%arg0: i32) -> (i32, i32, i32) {
    %c0_i32 = arith.constant 0 : i32
    %c0_i32_0 = arith.constant 0 : i32
    %c0_i32_1 = arith.constant 0 : i32
    return %arg0, %c0_i32, %c0_i32_0 : i32, i32, i32
  }
  func.func @transform_5(%arg0: i32) -> (i32, i32, i32) {
    %c0_i32 = arith.constant 0 : i32
    %c0_i32_0 = arith.constant 0 : i32
    %c0_i32_1 = arith.constant 0 : i32
    return %arg0, %c0_i32, %c0_i32_0 : i32, i32, i32
  }
}

module attributes {stable_mosaic.version = 11 : i64} {
  func.func @_bn_relu_add_kernel(%arg0: i32, %arg1: memref<128x16xf32, #tpu.memory_space<vmem>>, %arg2: memref<2x16xf32, #tpu.memory_space<vmem>>, %arg3: memref<128x16xf32, #tpu.memory_space<vmem>>, %arg4: memref<2x16xf32, #tpu.memory_space<vmem>>, %arg5: memref<128x16xf32, #tpu.memory_space<vmem>>) attributes {dimension_semantics = [#tpu.dimension_semantics<parallel>], iteration_bounds = array<i64: 1>, scalar_prefetch = 0 : i64, scratch_operands = 0 : i64, tpu.core_type = #tpu.core_type<tc>, window_params = [{transform_indices = @transform_0, window_bounds = array<i64: 128, 16>}, {pipeline_mode = #tpu.pipeline_mode<synchronous>, transform_indices = @transform_1, window_bounds = array<i64: 2, 16>}, {transform_indices = @transform_2, window_bounds = array<i64: 128, 16>}, {pipeline_mode = #tpu.pipeline_mode<synchronous>, transform_indices = @transform_3, window_bounds = array<i64: 2, 16>}, {transform_indices = @transform_4, window_bounds = array<i64: 128, 16>}]} {
    %c0 = arith.constant 0 : index
    %c0_0 = arith.constant 0 : index
    %0 = vector.load %arg1[%c0, %c0_0] : memref<128x16xf32, #tpu.memory_space<vmem>>, vector<128x16xf32>
    %c0_1 = arith.constant 0 : index
    %c0_2 = arith.constant 0 : index
    %1 = vector.load %arg2[%c0_1, %c0_2] : memref<2x16xf32, #tpu.memory_space<vmem>>, vector<1x16xf32>
    %2 = vector.broadcast %1 : vector<1x16xf32> to vector<128x16xf32>
    %3 = arith.mulf %0, %2 : vector<128x16xf32>
    %c1 = arith.constant 1 : index
    %c0_3 = arith.constant 0 : index
    %4 = vector.load %arg2[%c1, %c0_3] : memref<2x16xf32, #tpu.memory_space<vmem>>, vector<1x16xf32>
    %5 = vector.broadcast %4 : vector<1x16xf32> to vector<128x16xf32>
    %6 = arith.addf %3, %5 : vector<128x16xf32>
    %cst = arith.constant 0.000000e+00 : f32
    %7 = vector.broadcast %cst : f32 to vector<128x16xf32>
    %8 = arith.maximumf %6, %7 : vector<128x16xf32>
    %c0_4 = arith.constant 0 : index
    %c0_5 = arith.constant 0 : index
    %9 = vector.load %arg3[%c0_4, %c0_5] : memref<128x16xf32, #tpu.memory_space<vmem>>, vector<128x16xf32>
    %c0_6 = arith.constant 0 : index
    %c0_7 = arith.constant 0 : index
    %10 = vector.load %arg4[%c0_6, %c0_7] : memref<2x16xf32, #tpu.memory_space<vmem>>, vector<1x16xf32>
    %11 = vector.broadcast %10 : vector<1x16xf32> to vector<128x16xf32>
    %12 = arith.mulf %9, %11 : vector<128x16xf32>
    %13 = arith.addf %8, %12 : vector<128x16xf32>
    %c1_8 = arith.constant 1 : index
    %c0_9 = arith.constant 0 : index
    %14 = vector.load %arg4[%c1_8, %c0_9] : memref<2x16xf32, #tpu.memory_space<vmem>>, vector<1x16xf32>
    %15 = vector.broadcast %14 : vector<1x16xf32> to vector<128x16xf32>
    %16 = arith.addf %13, %15 : vector<128x16xf32>
    %c0_10 = arith.constant 0 : index
    %c0_11 = arith.constant 0 : index
    %17 = vector.load %arg5[%c0_10, %c0_11] : memref<128x16xf32, #tpu.memory_space<vmem>>, vector<128x16xf32>
    tpu.vector_store %arg5[%c0_10, %c0_11], %16 {strides = array<i32>} : memref<128x16xf32, #tpu.memory_space<vmem>>, vector<128x16xf32>,
    return
  }
  func.func @transform_0(%arg0: i32) -> (i32, i32) {
    %c0_i32 = arith.constant 0 : i32
    %c0_i32_0 = arith.constant 0 : i32
    return %arg0, %c0_i32 : i32, i32
  }
  func.func @transform_1(%arg0: i32) -> (i32, i32) {
    %c0_i32 = arith.constant 0 : i32
    %c0_i32_0 = arith.constant 0 : i32
    %c0_i32_1 = arith.constant 0 : i32
    return %c0_i32, %c0_i32_0 : i32, i32
  }
  func.func @transform_2(%arg0: i32) -> (i32, i32) {
    %c0_i32 = arith.constant 0 : i32
    %c0_i32_0 = arith.constant 0 : i32
    return %arg0, %c0_i32 : i32, i32
  }
  func.func @transform_3(%arg0: i32) -> (i32, i32) {
    %c0_i32 = arith.constant 0 : i32
    %c0_i32_0 = arith.constant 0 : i32
    %c0_i32_1 = arith.constant 0 : i32
    return %c0_i32, %c0_i32_0 : i32, i32
  }
  func.func @transform_4(%arg0: i32) -> (i32, i32) {
    %c0_i32 = arith.constant 0 : i32
    %c0_i32_0 = arith.constant 0 : i32
    return %arg0, %c0_i32 : i32, i32
  }
}

</mosaic_0001>

<bundles_post_ra>
// kernel: bottleneck_forward.5
= control target key start
LH: loop header
LB: loop body
LE: loop exit
PB: predicated region body
PF: predicated region fallthrough
CT: control target
= control target key end

     0   :  { %s752_s18 = smov 0   ;;  %s894_s0 = inlined_call_operand.vmem [shape: f32[512,4], index: 0, kind: input, shape index: {}]   ;;  %s895_s1 = inlined_call_operand.vmem [shape: bf16[4,4], index: 1, kind: input, shape index: {}]   ;;  %s896_s2 = inlined_call_operand.vmem [shape: f32[2,4], index: 2, kind: input, shape index: {}]   ;;  %s897_s3 = inlined_call_operand.vmem [shape: f32[512,4], index: 3, kind: output, shape index: {0}]   ;;  %s898_s4 = inlined_call_operand.vmem [shape: f32[4,1,4], index: 4, kind: output, shape index: {1}]   ;;  %s899_s5 = inlined_call_operand.vmem [shape: f32[4,1,4], index: 5, kind: output, shape index: {2}]  }
   0x1 LB: > { %s758_s19 = sadd.s32 4294967295, %s720_s18   ;;  %p658_p0 = scmp.ge.s32.totalorder %s720_s18, 1  ;;  %s720_s18 = sphi %s752_s18, %s16_s18  }
   0x2   : > { %p193_p1 = scmp.lt.s32.totalorder %s720_s18, 5 }
   0x4   : > { %p194_p2 = pnand %p658_p0, %p193_p1 }
   0x5   : > { %v312_v0 = vld [vmem:[%s895_s1] sm:$0x3] (!%p194_p2)  ;;  %vm338_vm0 = vcmask (!%p194_p2), 1041408   ;;  %s659_s22 = sshll.u32 (!%p194_p2), %s758_s19, 4  ;;  %vm313_vm1 = vcmask (!%p194_p2), 31744   ;;  %p239_p4 = scmp.lt.s32.totalorder (!%p194_p2), %s758_s19, 3 }
   0x6   : > { %197 = sbr.rel (%p194_p2) target bundleno = 285 (0x11d), region = 32  ;;  %704 = vmatprep.subr.msk.bf16.mxu0 (!%p194_p2), %vm338_vm0, %v312_v0  ;;  %v340_v1 = vsel (!%p194_p2), %vm338_vm0, %v312_v0, 0  ;;  %p228_p3 = scmp.lt.s32.totalorder (!%p194_p2), %s659_s22, 63  ;;  %705 = vmatprep.subr.msk.bf16.mxu1 (!%p194_p2), %vm338_vm0, %v312_v0  ;;  %v663_v2 = vld [vmem:[%s896_s2] ss:$0 sm:$0xff] (!%p194_p2)  ;;  %vm492_vm2 = vcmask (!%p194_p2), 24576  }
   0x7   : > { %685 = vmatpush3.bf16.msra.mxu0 (!%p194_p2), %v340_v1  ;;  %703 = vmatpush3.bf16.msra.mxu1 (!%p194_p2), %v340_v1  ;;  %v664_v3 = vld [vmem:[%s896_s2 + $0x1] ss:$0 sm:$0xff] (!%p194_p2) }
   0xd   : > { %s901_s22 = smov (!%p228_p3, %s659_s22), 63  ;;  %s903_s19 = smov (!%p239_p4, %s758_s19), 3 }
   0xe   : > { %s660_s23 = sshll.u32 %s901_s22, 3  ;;  %s241_s11 = scalar_lea.vmem %s898_s4, %s903_s19 }
   0xf   : > { %s777_s28 = scalar_lea.vmem %s894_s0, %s660_s23  ;;  %s811_s8 = scalar_lea.vmem %s897_s3, %s660_s23 }
  0x10   : > { %v246_v4 = vld [vmem:[%s777_s28] sm:$0xff]  ;;  %v247_v5 = vld [vmem:[%s777_s28 + $0x8] sm:$0xff]  ;;  %v248_v6 = vld [vmem:[%s777_s28 + $0x10] sm:$0xff]  ;;  %s244_s14 = scalar_lea.vmem %s899_s5, %s903_s19 }
  0x11   : > { %v267_v7 = vmul.f32 %v663_v2, %v246_v4  ;;  %v268_v8 = vmul.f32 %v663_v2, %v247_v5  ;;  %v249_v9 = vld [vmem:[%s777_s28 + $0x18] sm:$0xff]  ;;  %v269_v10 = vmul.f32 %v663_v2, %v248_v6  ;;  %v250_v11 = vld [vmem:[%s777_s28 + $0x20] sm:$0xff]  ;;  %v251_v12 = vld [vmem:[%s777_s28 + $0x28] sm:$0xff] }
  0x12   : > { %v270_v13 = vmul.f32 %v663_v2, %v249_v9  ;;  %v271_v14 = vmul.f32 %v663_v2, %v250_v11  ;;  %v272_v15 = vmul.f32 %v663_v2, %v251_v12  ;;  %v252_v16 = vld [vmem:[%s777_s28 + $0x30] sm:$0xff]  ;;  %v253_v17 = vld [vmem:[%s777_s28 + $0x38] sm:$0xff]  ;;  %v254_v18 = vld [vmem:[%s777_s28 + $0x40] sm:$0xff] }
  0x13   : > { %v288_v19 = vadd.f32 %v664_v3, %v267_v7  ;;  %v289_v20 = vadd.f32 %v664_v3, %v268_v8  ;;  %v290_v21 = vadd.f32 %v664_v3, %v269_v10  ;;  %v273_v22 = vmul.f32 %v663_v2, %v252_v16  ;;  %v255_v23 = vld [vmem:[%s777_s28 + $0x48] sm:$0xff]  ;;  %v256_v24 = vld [vmem:[%s777_s28 + $0x50] sm:$0xff]  ;;  %v257_v29 = vld [vmem:[%s777_s28 + $0x58] sm:$0xff] }
  0x14   : > { %v291_v25 = vadd.f32 %v664_v3, %v270_v13  ;;  %v292_v26 = vadd.f32 %v664_v3, %v271_v14  ;;  %v293_v27 = vadd.f32 %v664_v3, %v272_v15  ;;  %v274_v28 = vmul.f32 %v663_v2, %v253_v17  ;;  %v258_v30 = vld [vmem:[%s777_s28 + $0x60] sm:$0xff]  ;;  %v259_v34 = vld [vmem:[%s777_s28 + $0x68] sm:$0xff]  ;;  %v260_v35 = vld [vmem:[%s777_s28 + $0x70] sm:$0xff] }
  0x15   : > { %v304_v31 = vpack.c.bf16 %v289_v20, %v288_v19  ;;  %v275_v32 = vmul.f32 %v663_v2, %v254_v18  ;;  %v276_v33 = vmul.f32 %v663_v2, %v255_v23  ;;  %v294_v38 = vadd.f32 %v664_v3, %v273_v22  ;;  %v261_v40 = vld [vmem:[%s777_s28 + $0x78] sm:$0xff] }
  0x16   : > { %v305_v36 = vpack.c.bf16 %v291_v25, %v290_v21  ;;  %v306_v37 = vpack.c.bf16 %v293_v27, %v292_v26  ;;  %v277_v39 = vmul.f32 %v663_v2, %v256_v24  ;;  %v278_v43 = vmul.f32 %v663_v2, %v257_v29 }
  0x17   : > { %686 = vmatprep.mubr.msk.bf16.mxu0 %vm313_vm1, %v304_v31  ;;  %v296_v41 = vadd.f32 %v664_v3, %v275_v32  ;;  %v297_v42 = vadd.f32 %v664_v3, %v276_v33  ;;  %v279_v44 = vmul.f32 %v663_v2, %v258_v30  ;;  %v295_v45 = vadd.f32 %v664_v3, %v274_v28 }
  0x18   : > { %687 = vmatmul.mubr.msk.bf16.vlgmr.msra.gmra.mrb[0].mxu0 %vm313_vm1, %v305_v36  ;;  %v298_v46 = vadd.f32 %v664_v3, %v277_v39  ;;  %v280_v47 = vmul.f32 %v663_v2, %v259_v34  ;;  %v281_v48 = vmul.f32 %v663_v2, %v260_v35  ;;  %v299_v50 = vadd.f32 %v664_v3, %v278_v43 }
  0x19   : > { %690 = vmatprep.mubr.msk.bf16.mxu0 %vm313_vm1, %v306_v37  ;;  %v308_v49 = vpack.c.bf16 %v297_v42, %v296_v41  ;;  %v300_v51 = vadd.f32 %v664_v3, %v279_v44  ;;  %v282_v52 = vmul.f32 %v663_v2, %v261_v40  ;;  %v307_v55 = vpack.c.bf16 %v295_v45, %v294_v38 }
  0x1a   : > { %v301_v53 = vadd.f32 %v664_v3, %v280_v47  ;;  %v309_v54 = vpack.c.bf16 %v299_v50, %v298_v46  ;;  %v302_v57 = vadd.f32 %v664_v3, %v281_v48 }
  0x1b   : > { %694 = vmatprep.mubr.msk.bf16.mxu1 %vm313_vm1, %v308_v49  ;;  %v303_v58 = vadd.f32 %v664_v3, %v282_v52 }
  0x1c   : > { %v310_v56 = vpack.c.bf16 %v301_v53, %v300_v51  ;;  %695 = vmatmul.mubr.msk.bf16.vlgmr.msra.gmra.mrb[0].mxu1 %vm313_vm1, %v309_v54 }
  0x1d   : > { %v311_v59 = vpack.c.bf16 %v303_v58, %v302_v57 }
  0x1e   : > { %698 = vmatprep.mubr.msk.bf16.mxu1 %vm313_vm1, %v310_v56 }
  0x20   : > { %691 = vmatmul.mubr.msk.bf16.gmra.mrb[4].mxu0 %vm313_vm1, %v307_v55 }
  0x24   : > { %699 = vmatmul.mubr.msk.bf16.gmra.mrb[4].mxu1 %vm313_vm1, %v311_v59 }
  0xeb   : > { %v688_v60 = vpop.f32.mrb[0].mxu0 }
  0xec   : > { %441 = vst.msk [vmem:[%s811_s8 + $0x10] sm:$0xff] %vm313_vm1, %v688_v60  ;;  %v376_v61 = vpop.f32.mrb[1].mxu0  ;;  %v496_v1 = vmul.f32 %v688_v60, %v688_v60  ;;  %v458_v7 = vsel %vm313_vm1, %v688_v60, 0.0 }
  0xed   : > { %439 = vst.msk [vmem:[%s811_s8] sm:$0xff] %vm313_vm1, %v376_v61  ;;  %v494_v62 = vmul.f32 %v376_v61, %v376_v61  ;;  %v689_v63 = vpop.f32.mrb[2].mxu0  ;;  %v455_v2 = vsel %vm313_vm1, %v376_v61, 0.0 }
  0xee   : > { %442 = vst.msk [vmem:[%s811_s8 + $0x18] sm:$0xff] %vm313_vm1, %v689_v63  ;;  %v379_v0 = vpop.f32.mrb[3].mxu0  ;;  %v497_v9 = vmul.f32 %v689_v63, %v689_v63  ;;  %v513_v15 = vsel %vm313_vm1, %v496_v1, 0.0  ;;  %v460_v16 = vsel %vm313_vm1, %v689_v63, 0.0 }
  0xef   : > { %440 = vst.msk [vmem:[%s811_s8 + $0x8] sm:$0xff] %vm313_vm1, %v379_v0  ;;  %v456_v3 = vsel %vm313_vm1, %v379_v0, 0.0  ;;  %v495_v4 = vmul.f32 %v379_v0, %v379_v0  ;;  %v823_v6 = vpop.f32.mrb[0].mxu1  ;;  %v510_v8 = vsel %vm313_vm1, %v494_v62, 0.0 }
  0xf0   : > { %v457_v5 = vadd.f32 %v456_v3, %v455_v2  ;;  %449 = vst.msk [vmem:[%s811_s8 + $0x50] sm:$0xff] %vm313_vm1, %v823_v6  ;;  %v408_v11 = vpop.f32.mrb[1].mxu1  ;;  %v515_v22 = vsel %vm313_vm1, %v497_v9, 0.0  ;;  %v504_v55 = vmul.f32 %v823_v6, %v823_v6  ;;  %v474_v59 = vsel %vm313_vm1, %v823_v6, 0.0 }
  0xf1   : > { %v511_v10 = vsel %vm313_vm1, %v495_v4, 0.0  ;;  %447 = vst.msk [vmem:[%s811_s8 + $0x40] sm:$0xff] %vm313_vm1, %v408_v11  ;;  %v697_v14 = vpop.f32.mrb[2].mxu1  ;;  %v502_v39 = vmul.f32 %v408_v11, %v408_v11  ;;  %v470_v46 = vsel %vm313_vm1, %v408_v11, 0.0 }
  0xf2   : > { %v459_v12 = vadd.f32 %v458_v7, %v457_v5  ;;  %v512_v13 = vadd.f32 %v511_v10, %v510_v8  ;;  %450 = vst.msk [vmem:[%s811_s8 + $0x58] sm:$0xff] %vm313_vm1, %v697_v14  ;;  %v411_v18 = vpop.f32.mrb[3].mxu1  ;;  %v505_v60 = vmul.f32 %v697_v14, %v697_v14  ;;  %v529_v1 = vsel %vm313_vm1, %v504_v55, 0.0 }
  0xf3   : > { %v692_v17 = vpop.f32.mrb[4].mxu0  ;;  %448 = vst.msk [vmem:[%s811_s8 + $0x48] sm:$0xff] %vm313_vm1, %v411_v18  ;;  %v525_v51 = vsel %vm313_vm1, %v502_v39, 0.0  ;;  %v503_v52 = vmul.f32 %v411_v18, %v411_v18  ;;  %v472_v56 = vsel %vm313_vm1, %v411_v18, 0.0  ;;  %v476_v2 = vsel %vm313_vm1, %v697_v14, 0.0 }
  0xf4   : > { %v514_v19 = vadd.f32 %v513_v15, %v512_v13  ;;  %445 = vst.msk [vmem:[%s811_s8 + $0x30] sm:$0xff] %vm313_vm1, %v692_v17  ;;  %v392_v20 = vpop.f32.mrb[5].mxu0  ;;  %v461_v21 = vadd.f32 %v460_v16, %v459_v12  ;;  %v500_v29 = vmul.f32 %v692_v17, %v692_v17  ;;  %v466_v36 = vsel %vm313_vm1, %v692_v17, 0.0 }
  0xf5   : > { %443 = vst.msk [vmem:[%s811_s8 + $0x20] sm:$0xff] %vm313_vm1, %v392_v20  ;;  %v462_v23 = vsel %vm313_vm1, %v392_v20, 0.0  ;;  %v498_v24 = vmul.f32 %v392_v20, %v392_v20  ;;  %v693_v25 = vpop.f32.mrb[6].mxu0  ;;  %v527_v61 = vsel %vm313_vm1, %v503_v52, 0.0  ;;  %v531_v7 = vsel %vm313_vm1, %v505_v60, 0.0 }
  0xf6   : > { %v463_v26 = vadd.f32 %v462_v23, %v461_v21  ;;  %v516_v27 = vadd.f32 %v515_v22, %v514_v19  ;;  %446 = vst.msk [vmem:[%s811_s8 + $0x38] sm:$0xff] %vm313_vm1, %v693_v25  ;;  %v395_v28 = vpop.f32.mrb[7].mxu0  ;;  %v501_v37 = vmul.f32 %v693_v25, %v693_v25  ;;  %v521_v44 = vsel %vm313_vm1, %v500_v29, 0.0 }
  0xf7   : > { %v517_v30 = vsel %vm313_vm1, %v498_v24, 0.0  ;;  %444 = vst.msk [vmem:[%s811_s8 + $0x28] sm:$0xff] %vm313_vm1, %v395_v28  ;;  %v464_v31 = vsel %vm313_vm1, %v395_v28, 0.0  ;;  %v499_v32 = vmul.f32 %v395_v28, %v395_v28  ;;  %v700_v35 = vpop.f32.mrb[4].mxu1  ;;  %v468_v45 = vsel %vm313_vm1, %v693_v25, 0.0 }
  0xf8   : > { %v518_v33 = vadd.f32 %v517_v30, %v516_v27  ;;  %v465_v34 = vadd.f32 %v464_v31, %v463_v26  ;;  %453 = vst.msk [vmem:[%s811_s8 + $0x70] sm:$0xff] %vm313_vm1, %v700_v35  ;;  %v424_v40 = vpop.f32.mrb[5].mxu1  ;;  %v523_v50 = vsel %vm313_vm1, %v501_v37, 0.0  ;;  %v508_v11 = vmul.f32 %v700_v35, %v700_v35 }
  0xf9   : > { %v519_v38 = vsel %vm313_vm1, %v499_v32, 0.0  ;;  %451 = vst.msk [vmem:[%s811_s8 + $0x60] sm:$0xff] %vm313_vm1, %v424_v40  ;;  %v701_v43 = vpop.f32.mrb[6].mxu1  ;;  %v506_v62 = vmul.f32 %v424_v40, %v424_v40  ;;  %v478_v3 = vsel %vm313_vm1, %v424_v40, 0.0  ;;  %v482_v16 = vsel %vm313_vm1, %v700_v35, 0.0 }
  0xfa   : > { %v467_v41 = vadd.f32 %v466_v36, %v465_v34  ;;  %v520_v42 = vadd.f32 %v519_v38, %v518_v33  ;;  %454 = vst.msk [vmem:[%s811_s8 + $0x78] sm:$0xff] %vm313_vm1, %v701_v43  ;;  %v427_v47 = vpop.f32.mrb[7].mxu1  ;;  %v509_v14 = vmul.f32 %v701_v43, %v701_v43  ;;  %v537_v20 = vsel %vm313_vm1, %v508_v11, 0.0 }
  0xfb   : > { %452 = vst.msk [vmem:[%s811_s8 + $0x68] sm:$0xff] %vm313_vm1, %v427_v47  ;;  %v533_v8 = vsel %vm313_vm1, %v506_v62, 0.0  ;;  %v507_v9 = vmul.f32 %v427_v47, %v427_v47  ;;  %v480_v12 = vsel %vm313_vm1, %v427_v47, 0.0  ;;  %v484_v21 = vsel %vm313_vm1, %v701_v43, 0.0 }
  0xfc   : > { %v522_v48 = vadd.f32 %v521_v44, %v520_v42  ;;  %v469_v49 = vadd.f32 %v468_v45, %v467_v41  ;;  %v539_v24 = vsel %vm313_vm1, %v509_v14, 0.0 }
  0xfd   : > { %v535_v17 = vsel %vm313_vm1, %v507_v9, 0.0 }
  0xfe   : > { %v471_v53 = vadd.f32 %v470_v46, %v469_v49  ;;  %v524_v54 = vadd.f32 %v523_v50, %v522_v48 }
 0x100   : > { %v526_v57 = vadd.f32 %v525_v51, %v524_v54  ;;  %v473_v58 = vadd.f32 %v472_v56, %v471_v53 }
 0x102   : > { %v475_v63 = vadd.f32 %v474_v59, %v473_v58  ;;  %v528_v0 = vadd.f32 %v527_v61, %v526_v57 }
 0x104   : > { %v530_v4 = vadd.f32 %v529_v1, %v528_v0  ;;  %v477_v5 = vadd.f32 %v476_v2, %v475_v63 }
 0x106   : > { %v479_v6 = vadd.f32 %v478_v3, %v477_v5  ;;  %v532_v10 = vadd.f32 %v531_v7, %v530_v4 }
 0x108   : > { %v534_v13 = vadd.f32 %v533_v8, %v532_v10  ;;  %v481_v15 = vadd.f32 %v480_v12, %v479_v6 }
 0x10a   : > { %v483_v18 = vadd.f32 %v482_v16, %v481_v15  ;;  %v536_v19 = vadd.f32 %v535_v17, %v534_v13 }
 0x10c   : > { %v485_v22 = vadd.f32 %v484_v21, %v483_v18  ;;  %v538_v23 = vadd.f32 %v537_v20, %v536_v19 }
 0x10e   : > { %v486_v25 = vrot.slane %v485_v22, 4  ;;  %v540_v26 = vadd.f32 %v539_v24, %v538_v23 }
 0x110   : > { %v487_v27 = vadd.f32 %v486_v25, %v485_v22  ;;  %v541_v28 = vrot.slane %v540_v26, 4 }
 0x112   : > { %v488_v29 = vrot.slane %v487_v27, 2  ;;  %v542_v30 = vadd.f32 %v541_v28, %v540_v26 }
 0x114   : > { %v489_v31 = vadd.f32 %v488_v29, %v487_v27  ;;  %v543_v32 = vrot.slane %v542_v30, 2 }
 0x116   : > { %v490_v33 = vrot.slane %v489_v31, 1  ;;  %v544_v34 = vadd.f32 %v543_v32, %v542_v30 }
 0x118   : > { %v491_v35 = vadd.f32 %v490_v33, %v489_v31  ;;  %v545_v36 = vrot.slane %v544_v34, 1 }
 0x11a   : > { %493 = vst.msk [vmem:[%s241_s11] sm:$0x1] %vm492_vm2, %v491_v35  ;;  %v546_v37 = vadd.f32 %v545_v36, %v544_v34 }
 0x11c   : > { %547 = vst.msk [vmem:[%s244_s14] sm:$0x1] %vm492_vm2, %v546_v37 }
 0x11d PF: > { %s16_s18 = sadd.s32 1, %s720_s18  }
 0x11e   : > { %p13_p5 = scmp.ge.s32.totalorder %s16_s18, 6  }
 0x120   :  { %15 = sbr.rel (!%p13_p5) target bundleno = 1 (0x1), region = 86 }

// kernel: bottleneck_forward.6
= control target key start
LH: loop header
LB: loop body
LE: loop exit
PB: predicated region body
PF: predicated region fallthrough
CT: control target
= control target key end

     0   :  { %vm145_vm0 = vcmask 1041408   ;;  %vm120_vm1 = vcmask 293888   ;;  %vm246_vm2 = vcmask 31744   ;;  %vm300_vm3 = vcmask 24576   ;;  %s688_s1 = inlined_call_operand.vmem [shape: bf16[36,4], index: 1, kind: input, shape index: {}]   ;;  %s689_s0 = inlined_call_operand.vmem [shape: bf16[128,36], index: 0, kind: input, shape index: {}]   ;;  %s690_s2 = inlined_call_operand.vmem [shape: f32[2,36], index: 2, kind: input, shape index: {}]   ;;  %s691_s3 = inlined_call_operand.vmem [shape: f32[128,4], index: 3, kind: output, shape index: {0}]   ;;  %s692_s4 = inlined_call_operand.vmem [shape: f32[1,1,4], index: 4, kind: output, shape index: {1}]   ;;  %s693_s5 = inlined_call_operand.vmem [shape: f32[1,1,4], index: 5, kind: output, shape index: {2}]  }
   0x1   :  { %v461_v0 = vld [vmem:[%s688_s1] sm:$0xff]   ;;  %v462_v1 = vld [vmem:[%s688_s1 + $0x8] sm:$0xff]   ;;  %v463_v2 = vld [vmem:[%s688_s1 + $0x10] ss:$0 sps:$4 sm:$0x33]  }
   0x2   :  { %431 = vmatprep.subr.bf16.mxu0 %v461_v0  ;;  %v382_v3 = vld [vmem:[%s689_s0] sm:$0xff]   ;;  %453 = vmatprep.subr.bf16.mxu1 %v461_v0  ;;  %v413_v8 = vld [vmem:[%s689_s0 + $0x8] sm:$0xff]   ;;  %v147_v9 = vsel %vm145_vm0, %v463_v2, 0  ;;  %v414_v12 = vld [vmem:[%s689_s0 + $0x10] sm:$0xff]  }
   0x3   :  { %432 = vmatpush3.bf16.msra.mxu0 %v461_v0  ;;  %v383_v4 = vunpack.c.l.bf16 %v382_v3  ;;  %v384_v5 = vunpack.c.h.bf16 %v382_v3  ;;  %v509_v6 = vld [vmem:[%s690_s2] ss:$0 sm:$0xff]  ;;  %v514_v7 = vld [vmem:[%s690_s2 + $0x1] ss:$0 sm:$0xff]  ;;  %456 = vmatpush3.bf16.msra.mxu1 %v461_v0  ;;  %v387_v10 = vunpack.c.l.bf16 %v413_v8  ;;  %v388_v11 = vunpack.c.h.bf16 %v413_v8  ;;  %v415_v13 = vld [vmem:[%s689_s0 + $0x18] sm:$0xff]  }
   0x4   :  { %433 = vmatprep.subr.bf16.mxu0 %v462_v1  ;;  %454 = vmatprep.subr.bf16.mxu1 %v462_v1  ;;  %v416_v14 = vld [vmem:[%s689_s0 + $0x20] sm:$0xff]   ;;  %v391_v17 = vunpack.c.l.bf16 %v414_v12  ;;  %v392_v18 = vunpack.c.h.bf16 %v414_v12  ;;  %v395_v21 = vunpack.c.l.bf16 %v415_v13  ;;  %v396_v22 = vunpack.c.h.bf16 %v415_v13  ;;  %v417_v31 = vld [vmem:[%s689_s0 + $0x28] sm:$0xff]   ;;  %v418_v36 = vld [vmem:[%s689_s0 + $0x30] sm:$0xff]  }
   0x5   :  { %v55_v15 = vmul.f32 %v383_v4, %v509_v6  ;;  %v56_v16 = vmul.f32 %v384_v5, %v509_v6  ;;  %v57_v19 = vmul.f32 %v387_v10, %v509_v6  ;;  %v58_v20 = vmul.f32 %v388_v11, %v509_v6  ;;  %v419_v44 = vld [vmem:[%s689_s0 + $0x38] sm:$0xff]  }
   0x6   :  { %v59_v25 = vmul.f32 %v391_v17, %v509_v6  ;;  %v399_v26 = vunpack.c.l.bf16 %v416_v14  ;;  %v60_v29 = vmul.f32 %v392_v18, %v509_v6  ;;  %v61_v30 = vmul.f32 %v395_v21, %v509_v6 }
   0x7   :  { %434 = vmatpush3.bf16.msra.mxu0 %v462_v1  ;;  %v76_v23 = vadd.f32 %v514_v7, %v55_v15  ;;  %v77_v24 = vadd.f32 %v514_v7, %v56_v16  ;;  %457 = vmatpush3.bf16.msra.mxu1 %v462_v1  ;;  %v78_v27 = vadd.f32 %v514_v7, %v57_v19  ;;  %v400_v35 = vunpack.c.h.bf16 %v416_v14 }
   0x8   :  { %459 = vmatprep.subr.msk.bf16.mxu0 %vm145_vm0, %v463_v2  ;;  %v79_v28 = vadd.f32 %v514_v7, %v58_v20  ;;  %v80_v33 = vadd.f32 %v514_v7, %v59_v25  ;;  %v62_v34 = vmul.f32 %v396_v22, %v509_v6  ;;  %460 = vmatprep.subr.msk.bf16.mxu1 %vm145_vm0, %v463_v2  ;;  %v403_v42 = vunpack.c.l.bf16 %v417_v31 }
   0x9   :  { %v92_v32 = vpack.c.bf16 %v77_v24, %v76_v23  ;;  %v81_v38 = vadd.f32 %v514_v7, %v60_v29  ;;  %v63_v39 = vmul.f32 %v399_v26, %v509_v6  ;;  %v82_v40 = vadd.f32 %v514_v7, %v61_v30 }
   0xa   :  { %v93_v37 = vpack.c.bf16 %v79_v28, %v78_v27  ;;  %v64_v41 = vmul.f32 %v400_v35, %v509_v6  ;;  %v404_v43 = vunpack.c.h.bf16 %v417_v31  ;;  %v407_v47 = vunpack.c.l.bf16 %v418_v36 }
   0xb   :  { %436 = vmatpush3.bf16.msra.mxu0 %v147_v9  ;;  %437 = vmatprep.mubr.msk.bf16.mxu0 %vm120_vm1, %v92_v32  ;;  %v94_v45 = vpack.c.bf16 %v81_v38, %v80_v33  ;;  %v84_v46 = vadd.f32 %v514_v7, %v63_v39  ;;  %v408_v48 = vunpack.c.h.bf16 %v418_v36  ;;  %v83_v49 = vadd.f32 %v514_v7, %v62_v34 }
   0xc   :  { %458 = vmatpush3.bf16.msra.mxu1 %v147_v9  ;;  %v85_v50 = vadd.f32 %v514_v7, %v64_v41  ;;  %v65_v51 = vmul.f32 %v403_v42, %v509_v6  ;;  %v66_v52 = vmul.f32 %v404_v43, %v509_v6  ;;  %v67_v53 = vmul.f32 %v407_v47, %v509_v6 }
   0xd   :  { %v68_v54 = vmul.f32 %v408_v48, %v509_v6  ;;  %v411_v55 = vunpack.c.l.bf16 %v419_v44  ;;  %v412_v56 = vunpack.c.h.bf16 %v419_v44  ;;  %v95_v1 = vpack.c.bf16 %v83_v49, %v82_v40 }
   0xe   :  { %438 = vmatmul.mubr.msk.bf16.vlgmr.msra.gmra.mrb[0].mxu0 %vm120_vm1, %v93_v37  ;;  %v96_v57 = vpack.c.bf16 %v85_v50, %v84_v46  ;;  %v86_v58 = vadd.f32 %v514_v7, %v65_v51  ;;  %v87_v59 = vadd.f32 %v514_v7, %v66_v52  ;;  %v88_v60 = vadd.f32 %v514_v7, %v67_v53 }
   0xf   :  { %441 = vmatprep.mubr.msk.bf16.mxu0 %vm120_vm1, %v94_v45  ;;  %v89_v61 = vadd.f32 %v514_v7, %v68_v54  ;;  %v69_v62 = vmul.f32 %v411_v55, %v509_v6  ;;  %v70_v63 = vmul.f32 %v412_v56, %v509_v6 }
  0x10   :  { %445 = vmatprep.mubr.msk.bf16.mxu1 %vm120_vm1, %v96_v57  ;;  %v97_v0 = vpack.c.bf16 %v87_v59, %v86_v58 }
  0x11   :  { %v98_v2 = vpack.c.bf16 %v89_v61, %v88_v60  ;;  %v90_v3 = vadd.f32 %v514_v7, %v69_v62  ;;  %v91_v4 = vadd.f32 %v514_v7, %v70_v63 }
  0x12   :  { %446 = vmatmul.mubr.msk.bf16.vlgmr.msra.gmra.mrb[0].mxu1 %vm120_vm1, %v97_v0 }
  0x13   :  { %449 = vmatprep.mubr.msk.bf16.mxu1 %vm120_vm1, %v98_v2  ;;  %v99_v5 = vpack.c.bf16 %v91_v4, %v90_v3 }
  0x16   :  { %442 = vmatmul.mubr.msk.bf16.gmra.mrb[4].mxu0 %vm120_vm1, %v95_v1 }
  0x1a   :  { %450 = vmatmul.mubr.msk.bf16.gmra.mrb[4].mxu1 %vm120_vm1, %v99_v5 }
  0xe1   :  { %v439_v6 = vpop.f32.mrb[0].mxu0 }
  0xe2   :  { %249 = vst.msk [vmem:[%s691_s3 + $0x10] sm:$0xff] %vm246_vm2, %v439_v6  ;;  %v183_v8 = vpop.f32.mrb[1].mxu0  ;;  %v304_v11 = vmul.f32 %v439_v6, %v439_v6  ;;  %v266_v17 = vsel %vm246_vm2, %v439_v6, 0.0 }
  0xe3   :  { %247 = vst.msk [vmem:[%s691_s3] sm:$0xff] %vm246_vm2, %v183_v8  ;;  %v302_v7 = vmul.f32 %v183_v8, %v183_v8  ;;  %v440_v9 = vpop.f32.mrb[2].mxu0  ;;  %v263_v12 = vsel %vm246_vm2, %v183_v8, 0.0 }
  0xe4   :  { %250 = vst.msk [vmem:[%s691_s3 + $0x18] sm:$0xff] %vm246_vm2, %v440_v9  ;;  %v186_v10 = vpop.f32.mrb[3].mxu0  ;;  %v305_v19 = vmul.f32 %v440_v9, %v440_v9  ;;  %v321_v25 = vsel %vm246_vm2, %v304_v11, 0.0  ;;  %v268_v26 = vsel %vm246_vm2, %v440_v9, 0.0 }
  0xe5   :  { %248 = vst.msk [vmem:[%s691_s3 + $0x8] sm:$0xff] %vm246_vm2, %v186_v10  ;;  %v264_v13 = vsel %vm246_vm2, %v186_v10, 0.0  ;;  %v303_v14 = vmul.f32 %v186_v10, %v186_v10  ;;  %v598_v16 = vpop.f32.mrb[0].mxu1  ;;  %v318_v18 = vsel %vm246_vm2, %v302_v7, 0.0 }
  0xe6   :  { %v265_v15 = vadd.f32 %v264_v13, %v263_v12  ;;  %257 = vst.msk [vmem:[%s691_s3 + $0x50] sm:$0xff] %vm246_vm2, %v598_v16  ;;  %v215_v21 = vpop.f32.mrb[1].mxu1  ;;  %v323_v32 = vsel %vm246_vm2, %v305_v19, 0.0  ;;  %v312_v1 = vmul.f32 %v598_v16, %v598_v16  ;;  %v282_v5 = vsel %vm246_vm2, %v598_v16, 0.0 }
  0xe7   :  { %v319_v20 = vsel %vm246_vm2, %v303_v14, 0.0  ;;  %255 = vst.msk [vmem:[%s691_s3 + $0x40] sm:$0xff] %vm246_vm2, %v215_v21  ;;  %v448_v24 = vpop.f32.mrb[2].mxu1  ;;  %v310_v49 = vmul.f32 %v215_v21, %v215_v21  ;;  %v278_v56 = vsel %vm246_vm2, %v215_v21, 0.0 }
  0xe8   :  { %v267_v22 = vadd.f32 %v266_v17, %v265_v15  ;;  %v320_v23 = vadd.f32 %v319_v20, %v318_v18  ;;  %258 = vst.msk [vmem:[%s691_s3 + $0x58] sm:$0xff] %vm246_vm2, %v448_v24  ;;  %v218_v28 = vpop.f32.mrb[3].mxu1  ;;  %v313_v6 = vmul.f32 %v448_v24, %v448_v24  ;;  %v337_v11 = vsel %vm246_vm2, %v312_v1, 0.0 }
  0xe9   :  { %v443_v27 = vpop.f32.mrb[4].mxu0  ;;  %256 = vst.msk [vmem:[%s691_s3 + $0x48] sm:$0xff] %vm246_vm2, %v218_v28  ;;  %v333_v61 = vsel %vm246_vm2, %v310_v49, 0.0  ;;  %v311_v62 = vmul.f32 %v218_v28, %v218_v28  ;;  %v280_v2 = vsel %vm246_vm2, %v218_v28, 0.0  ;;  %v284_v12 = vsel %vm246_vm2, %v448_v24, 0.0 }
  0xea   :  { %v322_v29 = vadd.f32 %v321_v25, %v320_v23  ;;  %253 = vst.msk [vmem:[%s691_s3 + $0x30] sm:$0xff] %vm246_vm2, %v443_v27  ;;  %v199_v30 = vpop.f32.mrb[5].mxu0  ;;  %v269_v31 = vadd.f32 %v268_v26, %v267_v22  ;;  %v308_v39 = vmul.f32 %v443_v27, %v443_v27  ;;  %v274_v46 = vsel %vm246_vm2, %v443_v27, 0.0 }
  0xeb   :  { %251 = vst.msk [vmem:[%s691_s3 + $0x20] sm:$0xff] %vm246_vm2, %v199_v30  ;;  %v270_v33 = vsel %vm246_vm2, %v199_v30, 0.0  ;;  %v306_v34 = vmul.f32 %v199_v30, %v199_v30  ;;  %v444_v35 = vpop.f32.mrb[6].mxu0  ;;  %v335_v8 = vsel %vm246_vm2, %v311_v62, 0.0  ;;  %v339_v17 = vsel %vm246_vm2, %v313_v6, 0.0 }
  0xec   :  { %v271_v36 = vadd.f32 %v270_v33, %v269_v31  ;;  %v324_v37 = vadd.f32 %v323_v32, %v322_v29  ;;  %254 = vst.msk [vmem:[%s691_s3 + $0x38] sm:$0xff] %vm246_vm2, %v444_v35  ;;  %v202_v38 = vpop.f32.mrb[7].mxu0  ;;  %v309_v47 = vmul.f32 %v444_v35, %v444_v35  ;;  %v329_v54 = vsel %vm246_vm2, %v308_v39, 0.0 }
  0xed   :  { %v325_v40 = vsel %vm246_vm2, %v306_v34, 0.0  ;;  %252 = vst.msk [vmem:[%s691_s3 + $0x28] sm:$0xff] %vm246_vm2, %v202_v38  ;;  %v272_v41 = vsel %vm246_vm2, %v202_v38, 0.0  ;;  %v307_v42 = vmul.f32 %v202_v38, %v202_v38  ;;  %v451_v45 = vpop.f32.mrb[4].mxu1  ;;  %v276_v55 = vsel %vm246_vm2, %v444_v35, 0.0 }
  0xee   :  { %v326_v43 = vadd.f32 %v325_v40, %v324_v37  ;;  %v273_v44 = vadd.f32 %v272_v41, %v271_v36  ;;  %261 = vst.msk [vmem:[%s691_s3 + $0x70] sm:$0xff] %vm246_vm2, %v451_v45  ;;  %v231_v50 = vpop.f32.mrb[5].mxu1  ;;  %v331_v60 = vsel %vm246_vm2, %v309_v47, 0.0  ;;  %v316_v21 = vmul.f32 %v451_v45, %v451_v45 }
  0xef   :  { %v327_v48 = vsel %vm246_vm2, %v307_v42, 0.0  ;;  %259 = vst.msk [vmem:[%s691_s3 + $0x60] sm:$0xff] %vm246_vm2, %v231_v50  ;;  %v452_v53 = vpop.f32.mrb[6].mxu1  ;;  %v314_v7 = vmul.f32 %v231_v50, %v231_v50  ;;  %v286_v13 = vsel %vm246_vm2, %v231_v50, 0.0  ;;  %v290_v26 = vsel %vm246_vm2, %v451_v45, 0.0 }
  0xf0   :  { %v275_v51 = vadd.f32 %v274_v46, %v273_v44  ;;  %v328_v52 = vadd.f32 %v327_v48, %v326_v43  ;;  %262 = vst.msk [vmem:[%s691_s3 + $0x78] sm:$0xff] %vm246_vm2, %v452_v53  ;;  %v234_v57 = vpop.f32.mrb[7].mxu1  ;;  %v317_v27 = vmul.f32 %v452_v53, %v452_v53  ;;  %v345_v30 = vsel %vm246_vm2, %v316_v21, 0.0 }
  0xf1   :  { %260 = vst.msk [vmem:[%s691_s3 + $0x68] sm:$0xff] %vm246_vm2, %v234_v57  ;;  %v341_v18 = vsel %vm246_vm2, %v314_v7, 0.0  ;;  %v315_v19 = vmul.f32 %v234_v57, %v234_v57  ;;  %v288_v22 = vsel %vm246_vm2, %v234_v57, 0.0  ;;  %v292_v31 = vsel %vm246_vm2, %v452_v53, 0.0 }
  0xf2   :  { %v330_v58 = vadd.f32 %v329_v54, %v328_v52  ;;  %v277_v59 = vadd.f32 %v276_v55, %v275_v51  ;;  %v347_v34 = vsel %vm246_vm2, %v317_v27, 0.0 }
  0xf3   :  { %v343_v24 = vsel %vm246_vm2, %v315_v19, 0.0 }
  0xf4   :  { %v279_v63 = vadd.f32 %v278_v56, %v277_v59  ;;  %v332_v0 = vadd.f32 %v331_v60, %v330_v58 }
  0xf6   :  { %v334_v3 = vadd.f32 %v333_v61, %v332_v0  ;;  %v281_v4 = vadd.f32 %v280_v2, %v279_v63 }
  0xf8   :  { %v283_v9 = vadd.f32 %v282_v5, %v281_v4  ;;  %v336_v10 = vadd.f32 %v335_v8, %v334_v3 }
  0xfa   :  { %v338_v14 = vadd.f32 %v337_v11, %v336_v10  ;;  %v285_v15 = vadd.f32 %v284_v12, %v283_v9 }
  0xfc   :  { %v287_v16 = vadd.f32 %v286_v13, %v285_v15  ;;  %v340_v20 = vadd.f32 %v339_v17, %v338_v14 }
  0xfe   :  { %v342_v23 = vadd.f32 %v341_v18, %v340_v20  ;;  %v289_v25 = vadd.f32 %v288_v22, %v287_v16 }
 0x100   :  { %v291_v28 = vadd.f32 %v290_v26, %v289_v25  ;;  %v344_v29 = vadd.f32 %v343_v24, %v342_v23 }
 0x102   :  { %v293_v32 = vadd.f32 %v292_v31, %v291_v28  ;;  %v346_v33 = vadd.f32 %v345_v30, %v344_v29 }
 0x104   :  { %v294_v35 = vrot.slane %v293_v32, 4  ;;  %v348_v36 = vadd.f32 %v347_v34, %v346_v33 }
 0x106   :  { %v295_v37 = vadd.f32 %v294_v35, %v293_v32  ;;  %v349_v38 = vrot.slane %v348_v36, 4 }
 0x108   :  { %v296_v39 = vrot.slane %v295_v37, 2  ;;  %v350_v40 = vadd.f32 %v349_v38, %v348_v36 }
 0x10a   :  { %v297_v41 = vadd.f32 %v296_v39, %v295_v37  ;;  %v351_v42 = vrot.slane %v350_v40, 2 }
 0x10c   :  { %v298_v43 = vrot.slane %v297_v41, 1  ;;  %v352_v44 = vadd.f32 %v351_v42, %v350_v40 }
 0x10e   :  { %v299_v45 = vadd.f32 %v298_v43, %v297_v41  ;;  %v353_v46 = vrot.slane %v352_v44, 1 }
 0x110   :  { %301 = vst.msk [vmem:[%s692_s4] sm:$0x1] %vm300_vm3, %v299_v45  ;;  %v354_v47 = vadd.f32 %v353_v46, %v352_v44 }
 0x112   :  { %355 = vst.msk [vmem:[%s693_s5] sm:$0x1] %vm300_vm3, %v354_v47 }

// kernel: bottleneck_forward.7
= control target key start
LH: loop header
LB: loop body
LE: loop exit
PB: predicated region body
PF: predicated region fallthrough
CT: control target
= control target key end

     0   :  { %vm110_vm0 = vcmask 1041408   ;;  %vm85_vm1 = vcmask 31744   ;;  %vm211_vm2 = vcmask 130048   ;;  %vm265_vm3 = vcmask 122880   ;;  %s577_s1 = inlined_call_operand.vmem [shape: bf16[4,16], index: 1, kind: input, shape index: {}]   ;;  %s578_s0 = inlined_call_operand.vmem [shape: f32[128,4], index: 0, kind: input, shape index: {}]   ;;  %s579_s2 = inlined_call_operand.vmem [shape: f32[2,4], index: 2, kind: input, shape index: {}]   ;;  %s580_s3 = inlined_call_operand.vmem [shape: f32[128,16], index: 3, kind: output, shape index: {0}]   ;;  %s581_s4 = inlined_call_operand.vmem [shape: f32[1,1,16], index: 4, kind: output, shape index: {1}]   ;;  %s582_s5 = inlined_call_operand.vmem [shape: f32[1,1,16], index: 5, kind: output, shape index: {2}]  }
   0x1   :  { %v84_v0 = vld [vmem:[%s577_s1] sm:$0x3]  ;;  %v19_v2 = vld [vmem:[%s578_s0 + $0x8] sm:$0xff]  ;;  %v20_v6 = vld [vmem:[%s578_s0 + $0x10] sm:$0xff] }
   0x2   :  { %v18_v1 = vld [vmem:[%s578_s0] sm:$0xff]  ;;  %372 = vmatprep.subr.msk.bf16.mxu0 %vm110_vm0, %v84_v0  ;;  %v112_v3 = vsel %vm110_vm0, %v84_v0, 0  ;;  %373 = vmatprep.subr.msk.bf16.mxu1 %vm110_vm0, %v84_v0  ;;  %v21_v9 = vld [vmem:[%s578_s0 + $0x18] sm:$0xff]  ;;  %v23_v12 = vld [vmem:[%s578_s0 + $0x28] sm:$0xff] }
   0x3   :  { %v333_v4 = vld [vmem:[%s579_s2] ss:$0 sm:$0xff]  ;;  %v334_v5 = vld [vmem:[%s579_s2 + $0x1] ss:$0 sm:$0xff]  ;;  %353 = vmatpush3.bf16.msra.mxu0 %v112_v3  ;;  %371 = vmatpush3.bf16.msra.mxu1 %v112_v3  ;;  %v24_v16 = vld [vmem:[%s578_s0 + $0x30] sm:$0xff] }
   0x4   :  { %v39_v7 = vmul.f32 %v333_v4, %v18_v1  ;;  %v40_v8 = vmul.f32 %v333_v4, %v19_v2  ;;  %v41_v10 = vmul.f32 %v333_v4, %v20_v6  ;;  %v22_v11 = vld [vmem:[%s578_s0 + $0x20] sm:$0xff]  ;;  %v42_v13 = vmul.f32 %v333_v4, %v21_v9  ;;  %v25_v17 = vld [vmem:[%s578_s0 + $0x38] sm:$0xff]  ;;  %v27_v23 = vld [vmem:[%s578_s0 + $0x48] sm:$0xff] }
   0x5   :  { %v43_v14 = vmul.f32 %v333_v4, %v22_v11  ;;  %v44_v15 = vmul.f32 %v333_v4, %v23_v12  ;;  %v26_v18 = vld [vmem:[%s578_s0 + $0x40] sm:$0xff]  ;;  %v45_v22 = vmul.f32 %v333_v4, %v24_v16  ;;  %v28_v24 = vld [vmem:[%s578_s0 + $0x50] sm:$0xff]  ;;  %v46_v28 = vmul.f32 %v333_v4, %v25_v17  ;;  %v29_v29 = vld [vmem:[%s578_s0 + $0x58] sm:$0xff] }
   0x6   :  { %v60_v19 = vadd.f32 %v334_v5, %v39_v7  ;;  %v61_v20 = vadd.f32 %v334_v5, %v40_v8  ;;  %v62_v21 = vadd.f32 %v334_v5, %v41_v10  ;;  %v63_v25 = vadd.f32 %v334_v5, %v42_v13  ;;  %v30_v30 = vld [vmem:[%s578_s0 + $0x60] sm:$0xff]  ;;  %v31_v34 = vld [vmem:[%s578_s0 + $0x68] sm:$0xff]  ;;  %v32_v35 = vld [vmem:[%s578_s0 + $0x70] sm:$0xff] }
   0x7   :  { %v64_v26 = vadd.f32 %v334_v5, %v43_v14  ;;  %v65_v27 = vadd.f32 %v334_v5, %v44_v15  ;;  %v47_v32 = vmul.f32 %v333_v4, %v26_v18  ;;  %v48_v33 = vmul.f32 %v333_v4, %v27_v23  ;;  %v33_v40 = vld [vmem:[%s578_s0 + $0x78] sm:$0xff] }
   0x8   :  { %v76_v31 = vpack.c.bf16 %v61_v20, %v60_v19  ;;  %v77_v36 = vpack.c.bf16 %v63_v25, %v62_v21  ;;  %v66_v38 = vadd.f32 %v334_v5, %v45_v22  ;;  %v49_v39 = vmul.f32 %v333_v4, %v28_v24 }
   0x9   :  { %v78_v37 = vpack.c.bf16 %v65_v27, %v64_v26  ;;  %v68_v41 = vadd.f32 %v334_v5, %v47_v32  ;;  %v69_v42 = vadd.f32 %v334_v5, %v48_v33  ;;  %v50_v43 = vmul.f32 %v333_v4, %v29_v29 }
   0xa   :  { %354 = vmatprep.mubr.msk.bf16.mxu0 %vm85_vm1, %v76_v31  ;;  %v51_v44 = vmul.f32 %v333_v4, %v30_v30  ;;  %v67_v45 = vadd.f32 %v334_v5, %v46_v28  ;;  %v70_v46 = vadd.f32 %v334_v5, %v49_v39  ;;  %v52_v47 = vmul.f32 %v333_v4, %v31_v34 }
   0xb   :  { %355 = vmatmul.mubr.msk.bf16.vlgmr.msra.gmra.mrb[0].mxu0 %vm85_vm1, %v77_v36  ;;  %v53_v48 = vmul.f32 %v333_v4, %v32_v35  ;;  %v80_v49 = vpack.c.bf16 %v69_v42, %v68_v41  ;;  %v71_v50 = vadd.f32 %v334_v5, %v50_v43  ;;  %v54_v52 = vmul.f32 %v333_v4, %v33_v40 }
   0xc   :  { %358 = vmatprep.mubr.msk.bf16.mxu0 %vm85_vm1, %v78_v37  ;;  %v72_v51 = vadd.f32 %v334_v5, %v51_v44  ;;  %v73_v53 = vadd.f32 %v334_v5, %v52_v47  ;;  %v79_v55 = vpack.c.bf16 %v67_v45, %v66_v38 }
   0xd   :  { %362 = vmatprep.mubr.msk.bf16.mxu1 %vm85_vm1, %v80_v49  ;;  %v81_v54 = vpack.c.bf16 %v71_v50, %v70_v46  ;;  %v74_v57 = vadd.f32 %v334_v5, %v53_v48  ;;  %v75_v58 = vadd.f32 %v334_v5, %v54_v52 }
   0xe   :  { %v82_v56 = vpack.c.bf16 %v73_v53, %v72_v51 }
   0xf   :  { %363 = vmatmul.mubr.msk.bf16.vlgmr.msra.gmra.mrb[0].mxu1 %vm85_vm1, %v81_v54  ;;  %v83_v59 = vpack.c.bf16 %v75_v58, %v74_v57 }
  0x10   :  { %366 = vmatprep.mubr.msk.bf16.mxu1 %vm85_vm1, %v82_v56 }
  0x13   :  { %359 = vmatmul.mubr.msk.bf16.gmra.mrb[4].mxu0 %vm85_vm1, %v79_v55 }
  0x17   :  { %367 = vmatmul.mubr.msk.bf16.gmra.mrb[4].mxu1 %vm85_vm1, %v83_v59 }
  0xde   :  { %v356_v60 = vpop.f32.mrb[0].mxu0 }
  0xdf   :  { %214 = vst.msk [vmem:[%s580_s3 + $0x10] sm:$0xff] %vm211_vm2, %v356_v60  ;;  %v148_v61 = vpop.f32.mrb[1].mxu0  ;;  %v269_v1 = vmul.f32 %v356_v60, %v356_v60  ;;  %v231_v7 = vsel %vm211_vm2, %v356_v60, 0.0 }
  0xe0   :  { %212 = vst.msk [vmem:[%s580_s3] sm:$0xff] %vm211_vm2, %v148_v61  ;;  %v267_v62 = vmul.f32 %v148_v61, %v148_v61  ;;  %v357_v63 = vpop.f32.mrb[2].mxu0  ;;  %v228_v2 = vsel %vm211_vm2, %v148_v61, 0.0 }
  0xe1   :  { %215 = vst.msk [vmem:[%s580_s3 + $0x18] sm:$0xff] %vm211_vm2, %v357_v63  ;;  %v151_v0 = vpop.f32.mrb[3].mxu0  ;;  %v270_v9 = vmul.f32 %v357_v63, %v357_v63  ;;  %v286_v15 = vsel %vm211_vm2, %v269_v1, 0.0  ;;  %v233_v16 = vsel %vm211_vm2, %v357_v63, 0.0 }
  0xe2   :  { %213 = vst.msk [vmem:[%s580_s3 + $0x8] sm:$0xff] %vm211_vm2, %v151_v0  ;;  %v229_v3 = vsel %vm211_vm2, %v151_v0, 0.0  ;;  %v268_v4 = vmul.f32 %v151_v0, %v151_v0  ;;  %v487_v6 = vpop.f32.mrb[0].mxu1  ;;  %v283_v8 = vsel %vm211_vm2, %v267_v62, 0.0 }
  0xe3   :  { %v230_v5 = vadd.f32 %v229_v3, %v228_v2  ;;  %222 = vst.msk [vmem:[%s580_s3 + $0x50] sm:$0xff] %vm211_vm2, %v487_v6  ;;  %v180_v11 = vpop.f32.mrb[1].mxu1  ;;  %v288_v22 = vsel %vm211_vm2, %v270_v9, 0.0  ;;  %v277_v55 = vmul.f32 %v487_v6, %v487_v6  ;;  %v247_v59 = vsel %vm211_vm2, %v487_v6, 0.0 }
  0xe4   :  { %v284_v10 = vsel %vm211_vm2, %v268_v4, 0.0  ;;  %220 = vst.msk [vmem:[%s580_s3 + $0x40] sm:$0xff] %vm211_vm2, %v180_v11  ;;  %v365_v14 = vpop.f32.mrb[2].mxu1  ;;  %v275_v39 = vmul.f32 %v180_v11, %v180_v11  ;;  %v243_v46 = vsel %vm211_vm2, %v180_v11, 0.0 }
  0xe5   :  { %v232_v12 = vadd.f32 %v231_v7, %v230_v5  ;;  %v285_v13 = vadd.f32 %v284_v10, %v283_v8  ;;  %223 = vst.msk [vmem:[%s580_s3 + $0x58] sm:$0xff] %vm211_vm2, %v365_v14  ;;  %v183_v18 = vpop.f32.mrb[3].mxu1  ;;  %v278_v60 = vmul.f32 %v365_v14, %v365_v14  ;;  %v302_v1 = vsel %vm211_vm2, %v277_v55, 0.0 }
  0xe6   :  { %v360_v17 = vpop.f32.mrb[4].mxu0  ;;  %221 = vst.msk [vmem:[%s580_s3 + $0x48] sm:$0xff] %vm211_vm2, %v183_v18  ;;  %v298_v51 = vsel %vm211_vm2, %v275_v39, 0.0  ;;  %v276_v52 = vmul.f32 %v183_v18, %v183_v18  ;;  %v245_v56 = vsel %vm211_vm2, %v183_v18, 0.0  ;;  %v249_v2 = vsel %vm211_vm2, %v365_v14, 0.0 }
  0xe7   :  { %v287_v19 = vadd.f32 %v286_v15, %v285_v13  ;;  %218 = vst.msk [vmem:[%s580_s3 + $0x30] sm:$0xff] %vm211_vm2, %v360_v17  ;;  %v164_v20 = vpop.f32.mrb[5].mxu0  ;;  %v234_v21 = vadd.f32 %v233_v16, %v232_v12  ;;  %v273_v29 = vmul.f32 %v360_v17, %v360_v17  ;;  %v239_v36 = vsel %vm211_vm2, %v360_v17, 0.0 }
  0xe8   :  { %216 = vst.msk [vmem:[%s580_s3 + $0x20] sm:$0xff] %vm211_vm2, %v164_v20  ;;  %v235_v23 = vsel %vm211_vm2, %v164_v20, 0.0  ;;  %v271_v24 = vmul.f32 %v164_v20, %v164_v20  ;;  %v361_v25 = vpop.f32.mrb[6].mxu0  ;;  %v300_v61 = vsel %vm211_vm2, %v276_v52, 0.0  ;;  %v304_v7 = vsel %vm211_vm2, %v278_v60, 0.0 }
  0xe9   :  { %v236_v26 = vadd.f32 %v235_v23, %v234_v21  ;;  %v289_v27 = vadd.f32 %v288_v22, %v287_v19  ;;  %219 = vst.msk [vmem:[%s580_s3 + $0x38] sm:$0xff] %vm211_vm2, %v361_v25  ;;  %v167_v28 = vpop.f32.mrb[7].mxu0  ;;  %v274_v37 = vmul.f32 %v361_v25, %v361_v25  ;;  %v294_v44 = vsel %vm211_vm2, %v273_v29, 0.0 }
  0xea   :  { %v290_v30 = vsel %vm211_vm2, %v271_v24, 0.0  ;;  %217 = vst.msk [vmem:[%s580_s3 + $0x28] sm:$0xff] %vm211_vm2, %v167_v28  ;;  %v237_v31 = vsel %vm211_vm2, %v167_v28, 0.0  ;;  %v272_v32 = vmul.f32 %v167_v28, %v167_v28  ;;  %v368_v35 = vpop.f32.mrb[4].mxu1  ;;  %v241_v45 = vsel %vm211_vm2, %v361_v25, 0.0 }
  0xeb   :  { %v291_v33 = vadd.f32 %v290_v30, %v289_v27  ;;  %v238_v34 = vadd.f32 %v237_v31, %v236_v26  ;;  %226 = vst.msk [vmem:[%s580_s3 + $0x70] sm:$0xff] %vm211_vm2, %v368_v35  ;;  %v196_v40 = vpop.f32.mrb[5].mxu1  ;;  %v296_v50 = vsel %vm211_vm2, %v274_v37, 0.0  ;;  %v281_v11 = vmul.f32 %v368_v35, %v368_v35 }
  0xec   :  { %v292_v38 = vsel %vm211_vm2, %v272_v32, 0.0  ;;  %224 = vst.msk [vmem:[%s580_s3 + $0x60] sm:$0xff] %vm211_vm2, %v196_v40  ;;  %v369_v43 = vpop.f32.mrb[6].mxu1  ;;  %v279_v62 = vmul.f32 %v196_v40, %v196_v40  ;;  %v251_v3 = vsel %vm211_vm2, %v196_v40, 0.0  ;;  %v255_v16 = vsel %vm211_vm2, %v368_v35, 0.0 }
  0xed   :  { %v240_v41 = vadd.f32 %v239_v36, %v238_v34  ;;  %v293_v42 = vadd.f32 %v292_v38, %v291_v33  ;;  %227 = vst.msk [vmem:[%s580_s3 + $0x78] sm:$0xff] %vm211_vm2, %v369_v43  ;;  %v199_v47 = vpop.f32.mrb[7].mxu1  ;;  %v282_v17 = vmul.f32 %v369_v43, %v369_v43  ;;  %v310_v20 = vsel %vm211_vm2, %v281_v11, 0.0 }
  0xee   :  { %225 = vst.msk [vmem:[%s580_s3 + $0x68] sm:$0xff] %vm211_vm2, %v199_v47  ;;  %v306_v8 = vsel %vm211_vm2, %v279_v62, 0.0  ;;  %v280_v9 = vmul.f32 %v199_v47, %v199_v47  ;;  %v253_v12 = vsel %vm211_vm2, %v199_v47, 0.0  ;;  %v257_v21 = vsel %vm211_vm2, %v369_v43, 0.0 }
  0xef   :  { %v295_v48 = vadd.f32 %v294_v44, %v293_v42  ;;  %v242_v49 = vadd.f32 %v241_v45, %v240_v41  ;;  %v312_v24 = vsel %vm211_vm2, %v282_v17, 0.0 }
  0xf0   :  { %v308_v14 = vsel %vm211_vm2, %v280_v9, 0.0 }
  0xf1   :  { %v244_v53 = vadd.f32 %v243_v46, %v242_v49  ;;  %v297_v54 = vadd.f32 %v296_v50, %v295_v48 }
  0xf3   :  { %v299_v57 = vadd.f32 %v298_v51, %v297_v54  ;;  %v246_v58 = vadd.f32 %v245_v56, %v244_v53 }
  0xf5   :  { %v248_v63 = vadd.f32 %v247_v59, %v246_v58  ;;  %v301_v0 = vadd.f32 %v300_v61, %v299_v57 }
  0xf7   :  { %v303_v4 = vadd.f32 %v302_v1, %v301_v0  ;;  %v250_v5 = vadd.f32 %v249_v2, %v248_v63 }
  0xf9   :  { %v252_v6 = vadd.f32 %v251_v3, %v250_v5  ;;  %v305_v10 = vadd.f32 %v304_v7, %v303_v4 }
  0xfb   :  { %v307_v13 = vadd.f32 %v306_v8, %v305_v10  ;;  %v254_v15 = vadd.f32 %v253_v12, %v252_v6 }
  0xfd   :  { %v256_v18 = vadd.f32 %v255_v16, %v254_v15  ;;  %v309_v19 = vadd.f32 %v308_v14, %v307_v13 }
  0xff   :  { %v258_v22 = vadd.f32 %v257_v21, %v256_v18  ;;  %v311_v23 = vadd.f32 %v310_v20, %v309_v19 }
 0x101   :  { %v259_v25 = vrot.slane %v258_v22, 4  ;;  %v313_v26 = vadd.f32 %v312_v24, %v311_v23 }
 0x103   :  { %v260_v27 = vadd.f32 %v259_v25, %v258_v22  ;;  %v314_v28 = vrot.slane %v313_v26, 4 }
 0x105   :  { %v261_v29 = vrot.slane %v260_v27, 2  ;;  %v315_v30 = vadd.f32 %v314_v28, %v313_v26 }
 0x107   :  { %v262_v31 = vadd.f32 %v261_v29, %v260_v27  ;;  %v316_v32 = vrot.slane %v315_v30, 2 }
 0x109   :  { %v263_v33 = vrot.slane %v262_v31, 1  ;;  %v317_v34 = vadd.f32 %v316_v32, %v315_v30 }
 0x10b   :  { %v264_v35 = vadd.f32 %v263_v33, %v262_v31  ;;  %v318_v36 = vrot.slane %v317_v34, 1 }
 0x10d   :  { %266 = vst.msk [vmem:[%s581_s4] sm:$0x1] %vm265_vm3, %v264_v35  ;;  %v319_v37 = vadd.f32 %v318_v36, %v317_v34 }
 0x10f   :  { %320 = vst.msk [vmem:[%s582_s5] sm:$0x1] %vm265_vm3, %v319_v37 }

// kernel: bottleneck_forward.9
= control target key start
LH: loop header
LB: loop body
LE: loop exit
PB: predicated region body
PF: predicated region fallthrough
CT: control target
= control target key end

     0   :  { %vm165_vm0 = vcmask 130048   ;;  %s459_s0 = inlined_call_operand.vmem [shape: f32[128,16], index: 0, kind: input, shape index: {}, may-alias: {0,4}]   ;;  %s460_s1 = inlined_call_operand.vmem [shape: f32[2,16], index: 1, kind: input, shape index: {}]   ;;  %s461_s2 = inlined_call_operand.vmem [shape: f32[128,16], index: 2, kind: input, shape index: {}]   ;;  %s462_s3 = inlined_call_operand.vmem [shape: f32[2,16], index: 3, kind: input, shape index: {}]   ;;  %s463_s4 = inlined_call_operand.vmem [shape: f32[128,16], index: 4, kind: output, shape index: {}, may-alias: {0,4}]  }
   0x1   :  { %v17_v0 = vld [vmem:[%s459_s0] sm:$0xff]  ;;  %v18_v6 = vld [vmem:[%s459_s0 + $0x8] sm:$0xff]  ;;  %v19_v8 = vld [vmem:[%s459_s0 + $0x10] sm:$0xff] }
   0x2   :  { %v221_v1 = vld [vmem:[%s460_s1] ss:$0 sm:$0xff]  ;;  %v226_v2 = vld [vmem:[%s460_s1 + $0x1] ss:$0 sm:$0xff]  ;;  %v92_v7 = vld [vmem:[%s461_s2 + $0x8] sm:$0xff] }
   0x3   :  { %v38_v3 = vmul.f32 %v221_v1, %v17_v0  ;;  %v91_v4 = vld [vmem:[%s461_s2] sm:$0xff]  ;;  %v39_v11 = vmul.f32 %v221_v1, %v18_v6  ;;  %v40_v12 = vmul.f32 %v221_v1, %v19_v8  ;;  %v93_v13 = vld [vmem:[%s461_s2 + $0x10] sm:$0xff]  ;;  %v20_v14 = vld [vmem:[%s459_s0 + $0x18] sm:$0xff] }
   0x4   :  { %v235_v5 = vld [vmem:[%s462_s3] ss:$0 sm:$0xff]  ;;  %v94_v15 = vld [vmem:[%s461_s2 + $0x18] sm:$0xff]  ;;  %v41_v18 = vmul.f32 %v221_v1, %v20_v14  ;;  %v22_v22 = vld [vmem:[%s459_s0 + $0x28] sm:$0xff] }
   0x5   :  { %v59_v9 = vadd.f32 %v226_v2, %v38_v3  ;;  %v112_v10 = vmul.f32 %v235_v5, %v91_v4  ;;  %v113_v16 = vmul.f32 %v235_v5, %v92_v7  ;;  %v114_v17 = vmul.f32 %v235_v5, %v93_v13  ;;  %v21_v20 = vld [vmem:[%s459_s0 + $0x20] sm:$0xff]  ;;  %v96_v27 = vld [vmem:[%s461_s2 + $0x28] sm:$0xff]  ;;  %v23_v28 = vld [vmem:[%s459_s0 + $0x30] sm:$0xff] }
   0x6   :  { %v115_v19 = vmul.f32 %v235_v5, %v94_v15  ;;  %v95_v21 = vld [vmem:[%s461_s2 + $0x20] sm:$0xff]  ;;  %v60_v24 = vadd.f32 %v226_v2, %v39_v11  ;;  %v61_v25 = vadd.f32 %v226_v2, %v40_v12  ;;  %v42_v26 = vmul.f32 %v221_v1, %v21_v20  ;;  %v97_v29 = vld [vmem:[%s461_s2 + $0x30] sm:$0xff]  ;;  %v24_v39 = vld [vmem:[%s459_s0 + $0x38] sm:$0xff] }
   0x7   :  { %v75_v23 = vmax.f32 %v59_v9, 0.0  ;;  %v287_v30 = vld [vmem:[%s462_s3 + $0x1] ss:$0 sm:$0xff]  ;;  %v62_v31 = vadd.f32 %v226_v2, %v41_v18  ;;  %v116_v32 = vmul.f32 %v235_v5, %v95_v21  ;;  %v43_v33 = vmul.f32 %v221_v1, %v22_v22  ;;  %v98_v44 = vld [vmem:[%s461_s2 + $0x38] sm:$0xff]  ;;  %v26_v55 = vld [vmem:[%s459_s0 + $0x48] sm:$0xff] }
   0x8   :  { %v117_v34 = vmul.f32 %v235_v5, %v96_v27  ;;  %v76_v36 = vmax.f32 %v60_v24, 0.0  ;;  %v77_v37 = vmax.f32 %v61_v25, 0.0  ;;  %v63_v38 = vadd.f32 %v226_v2, %v42_v26  ;;  %v25_v53 = vld [vmem:[%s459_s0 + $0x40] sm:$0xff]  ;;  %v100_v60 = vld [vmem:[%s461_s2 + $0x48] sm:$0xff]  ;;  %v101_v4 = vld [vmem:[%s461_s2 + $0x50] sm:$0xff] }
   0x9   :  { %v128_v35 = vadd.f32 %v112_v10, %v75_v23  ;;  %v78_v40 = vmax.f32 %v62_v31, 0.0  ;;  %v64_v41 = vadd.f32 %v226_v2, %v43_v33  ;;  %v44_v42 = vmul.f32 %v221_v1, %v23_v28  ;;  %v99_v54 = vld [vmem:[%s461_s2 + $0x40] sm:$0xff]  ;;  %v102_v11 = vld [vmem:[%s461_s2 + $0x58] sm:$0xff] }
   0xa   :  { %v118_v43 = vmul.f32 %v235_v5, %v97_v29  ;;  %v129_v46 = vadd.f32 %v113_v16, %v76_v36  ;;  %v130_v47 = vadd.f32 %v114_v17, %v77_v37  ;;  %v79_v48 = vmax.f32 %v63_v38, 0.0  ;;  %v103_v21 = vld [vmem:[%s461_s2 + $0x60] sm:$0xff] }
   0xb   :  { %v149_v45 = vadd.f32 %v287_v30, %v128_v35  ;;  %v131_v49 = vadd.f32 %v115_v19, %v78_v40  ;;  %v80_v50 = vmax.f32 %v64_v41, 0.0  ;;  %v65_v51 = vadd.f32 %v226_v2, %v44_v42  ;;  %v105_v42 = vld [vmem:[%s461_s2 + $0x70] sm:$0xff] }
   0xc   :  { %v45_v52 = vmul.f32 %v221_v1, %v24_v39  ;;  %v150_v56 = vadd.f32 %v287_v30, %v129_v46  ;;  %v151_v57 = vadd.f32 %v287_v30, %v130_v47  ;;  %v132_v58 = vadd.f32 %v116_v32, %v79_v48  ;;  %v104_v32 = vld [vmem:[%s461_s2 + $0x68] sm:$0xff] }
   0xd   :  { %166 = vst.msk [vmem:[%s463_s4] sm:$0xff] %vm165_vm0, %v149_v45  ;;  %v119_v59 = vmul.f32 %v235_v5, %v98_v44  ;;  %v152_v61 = vadd.f32 %v287_v30, %v131_v49  ;;  %v133_v62 = vadd.f32 %v117_v34, %v80_v50  ;;  %v81_v63 = vmax.f32 %v65_v51, 0.0 }
   0xe   :  { %v66_v0 = vadd.f32 %v226_v2, %v45_v52  ;;  %v153_v6 = vadd.f32 %v287_v30, %v132_v58  ;;  %v46_v7 = vmul.f32 %v221_v1, %v25_v53  ;;  %v120_v8 = vmul.f32 %v235_v5, %v99_v54 }
   0xf   :  { %v47_v9 = vmul.f32 %v221_v1, %v26_v55  ;;  %v154_v12 = vadd.f32 %v287_v30, %v133_v62  ;;  %v134_v13 = vadd.f32 %v118_v43, %v81_v63  ;;  %v121_v15 = vmul.f32 %v235_v5, %v100_v60 }
  0x10   :  { %v82_v14 = vmax.f32 %v66_v0, 0.0  ;;  %v67_v17 = vadd.f32 %v226_v2, %v46_v7  ;;  %v122_v20 = vmul.f32 %v235_v5, %v101_v4  ;;  %v123_v26 = vmul.f32 %v235_v5, %v102_v11 }
  0x11   :  { %v68_v18 = vadd.f32 %v226_v2, %v47_v9  ;;  %v155_v23 = vadd.f32 %v287_v30, %v134_v13  ;;  %v124_v36 = vmul.f32 %v235_v5, %v103_v21  ;;  %v125_v45 = vmul.f32 %v235_v5, %v104_v32 }
  0x12   :  { %v135_v24 = vadd.f32 %v119_v59, %v82_v14  ;;  %v83_v27 = vmax.f32 %v67_v17, 0.0  ;;  %v126_v55 = vmul.f32 %v235_v5, %v105_v42 }
  0x13   :  { %v84_v28 = vmax.f32 %v68_v18, 0.0 }
  0x14   :  { %v27_v3 = vld [vmem:[%s459_s0 + $0x50] sm:$0xff]  ;;  %v156_v34 = vadd.f32 %v287_v30, %v135_v24  ;;  %v136_v38 = vadd.f32 %v120_v8, %v83_v27 }
  0x15   :  { %167 = vst.msk [vmem:[%s463_s4 + $0x8] sm:$0xff] %vm165_vm0, %v150_v56  ;;  %168 = vst.msk [vmem:[%s463_s4 + $0x10] sm:$0xff] %vm165_vm0, %v151_v57  ;;  %v48_v19 = vmul.f32 %v221_v1, %v27_v3  ;;  %v137_v39 = vadd.f32 %v121_v15, %v84_v28  ;;  %v106_v56 = vld [vmem:[%s461_s2 + $0x78] sm:$0xff] }
  0x16   :  { %v157_v48 = vadd.f32 %v287_v30, %v136_v38  ;;  %v127_v3 = vmul.f32 %v235_v5, %v106_v56 }
  0x17   :  { %v69_v29 = vadd.f32 %v226_v2, %v48_v19  ;;  %v158_v49 = vadd.f32 %v287_v30, %v137_v39 }
  0x19   :  { %v85_v40 = vmax.f32 %v69_v29, 0.0 }
  0x1b   :  { %v138_v50 = vadd.f32 %v122_v20, %v85_v40 }
  0x1c   :  { %v28_v10 = vld [vmem:[%s459_s0 + $0x58] sm:$0xff] }
  0x1d   :  { %169 = vst.msk [vmem:[%s463_s4 + $0x18] sm:$0xff] %vm165_vm0, %v152_v61  ;;  %v49_v25 = vmul.f32 %v221_v1, %v28_v10  ;;  %v159_v57 = vadd.f32 %v287_v30, %v138_v50 }
  0x1f   :  { %v70_v35 = vadd.f32 %v226_v2, %v49_v25 }
  0x21   :  { %v86_v43 = vmax.f32 %v70_v35, 0.0 }
  0x23   :  { %v139_v52 = vadd.f32 %v123_v26, %v86_v43 }
  0x24   :  { %v29_v16 = vld [vmem:[%s459_s0 + $0x60] sm:$0xff] }
  0x25   :  { %170 = vst.msk [vmem:[%s463_s4 + $0x20] sm:$0xff] %vm165_vm0, %v153_v6  ;;  %v50_v31 = vmul.f32 %v221_v1, %v29_v16  ;;  %v160_v60 = vadd.f32 %v287_v30, %v139_v52 }
  0x27   :  { %v71_v41 = vadd.f32 %v226_v2, %v50_v31 }
  0x29   :  { %v87_v51 = vmax.f32 %v71_v41, 0.0 }
  0x2b   :  { %v140_v58 = vadd.f32 %v124_v36, %v87_v51 }
  0x2c   :  { %v30_v22 = vld [vmem:[%s459_s0 + $0x68] sm:$0xff] }
  0x2d   :  { %171 = vst.msk [vmem:[%s463_s4 + $0x28] sm:$0xff] %vm165_vm0, %v154_v12  ;;  %v51_v37 = vmul.f32 %v221_v1, %v30_v22  ;;  %v161_v63 = vadd.f32 %v287_v30, %v140_v58 }
  0x2f   :  { %v72_v44 = vadd.f32 %v226_v2, %v51_v37 }
  0x31   :  { %v88_v53 = vmax.f32 %v72_v44, 0.0 }
  0x33   :  { %v141_v61 = vadd.f32 %v125_v45, %v88_v53 }
  0x34   :  { %v31_v33 = vld [vmem:[%s459_s0 + $0x70] sm:$0xff] }
  0x35   :  { %172 = vst.msk [vmem:[%s463_s4 + $0x30] sm:$0xff] %vm165_vm0, %v155_v23  ;;  %173 = vst.msk [vmem:[%s463_s4 + $0x38] sm:$0xff] %vm165_vm0, %v156_v34  ;;  %v52_v46 = vmul.f32 %v221_v1, %v31_v33 }
  0x37   :  { %v73_v54 = vadd.f32 %v226_v2, %v52_v46 }
  0x39   :  { %v89_v62 = vmax.f32 %v73_v54, 0.0 }
  0x3b   :  { %v142_v4 = vadd.f32 %v126_v55, %v89_v62 }
  0x3c   :  { %v32_v47 = vld [vmem:[%s459_s0 + $0x78] sm:$0xff] }
  0x3d   :  { %174 = vst.msk [vmem:[%s463_s4 + $0x40] sm:$0xff] %vm165_vm0, %v157_v48  ;;  %175 = vst.msk [vmem:[%s463_s4 + $0x48] sm:$0xff] %vm165_vm0, %v158_v49  ;;  %v53_v59 = vmul.f32 %v221_v1, %v32_v47  ;;  %v162_v1 = vadd.f32 %v287_v30, %v141_v61 }
  0x3e   :  { %176 = vst.msk [vmem:[%s463_s4 + $0x50] sm:$0xff] %vm165_vm0, %v159_v57  ;;  %177 = vst.msk [vmem:[%s463_s4 + $0x58] sm:$0xff] %vm165_vm0, %v160_v60 }
  0x3f   :  { %v74_v0 = vadd.f32 %v226_v2, %v53_v59  ;;  %178 = vst.msk [vmem:[%s463_s4 + $0x60] sm:$0xff] %vm165_vm0, %v161_v63  ;;  %179 = vst.msk [vmem:[%s463_s4 + $0x68] sm:$0xff] %vm165_vm0, %v162_v1  ;;  %v163_v2 = vadd.f32 %v287_v30, %v142_v4 }
  0x41   :  { %v90_v6 = vmax.f32 %v74_v0, 0.0  ;;  %180 = vst.msk [vmem:[%s463_s4 + $0x70] sm:$0xff] %vm165_vm0, %v163_v2 }
  0x43   :  { %v143_v5 = vadd.f32 %v127_v3, %v90_v6 }
  0x45   :  { %v164_v7 = vadd.f32 %v287_v30, %v143_v5 }
  0x47   :  { %181 = vst.msk [vmem:[%s463_s4 + $0x78] sm:$0xff] %vm165_vm0, %v164_v7 }

</bundles_post_ra>
